<compile_context>
chip_gen: v6e
topology: v6e:2x2x1
jax: 0.10.0
libtpu: 0.0.40
codegen_flags: <defaults>
</compile_context>

<pallas_src>
import jax
import jax.numpy as jnp
from jax.experimental import pallas as pl
from jax.experimental.pallas import tpu as pltpu

NACT = 5           # Sigmoid, Tanh, ReLU, GELU, Swish  (Edge.acts)
NOP = NACT + 2     # + Zero, Identity                  (Edge.num_ops())

VMEM_BUDGET = 40 << 20   # conservative tile budget across v5e/v6e (128 MiB) and v7x (64 MiB)


def _gelu(x):
    # tanh-approximate GELU; used identically in kernel and reference.
    # TODO(synk): if the original GELU class is the exact erf form, swap both.
    c = jnp.sqrt(2.0 / jnp.pi).astype(x.dtype)
    return 0.5 * x * (1.0 + jnp.tanh(c * (x + 0.044715 * x * x * x)))


def _esnode_kernel(edge_ref, op_ref, widx_ref, x_ref, w_ref, b_ref, o_ref):
    """One grid step = one (batch element, seq tile).

    edge_ref: SMEM [B] int32   sampled edge index (consumed by x index_map only)
    op_ref  : SMEM [B] int32   sampled op within the edge (0..NOP-1)
    widx_ref: SMEM [B] int32   flattened (edge, activation) weight-slab index
    x_ref   : VMEM [1,1,bs,D]  selected edge's input tile (f32)
    w_ref   : VMEM [ni*NACT,D,D]  ALL weight slabs, resident (bf16)
    b_ref   : VMEM [ni*NACT,1,D]  ALL bias slabs, resident (f32)
    o_ref   : VMEM [1,bs,D]    output tile
    """
    del edge_ref  # consumed by the x index_map only
    i = pl.program_id(0)
    op = op_ref[i]

    @pl.when(op == 0)                       # Zero
    def _():
        o_ref[...] = jnp.zeros_like(o_ref)

    @pl.when(op == 1)                       # Identity (exact f32 passthrough)
    def _():
        o_ref[...] = x_ref[0].astype(o_ref.dtype)

    @pl.when(op >= 2)                       # one activation of the edge Linear
    def _():
        x = x_ref[0, 0]                     # [bs, D]  f32
        idx = widx_ref[i]
        w = w_ref[idx]                      # [D, D]   bf16 (VMEM-resident, no per-step DMA)
        bias = b_ref[idx]                   # [1, D]   f32
        # bf16 x bf16 MXU matmul with f32 accumulation; only the selected slab.
        y = jnp.dot(x.astype(w.dtype), w,
                    preferred_element_type=jnp.float32) + bias
        k = op - 2

        @pl.when(k == 0)
        def _():
            o_ref[0] = jax.nn.sigmoid(y).astype(o_ref.dtype)

        @pl.when(k == 1)
        def _():
            o_ref[0] = jnp.tanh(y).astype(o_ref.dtype)

        @pl.when(k == 2)
        def _():
            o_ref[0] = jnp.maximum(y, 0.0).astype(o_ref.dtype)

        @pl.when(k == 3)
        def _():
            o_ref[0] = _gelu(y).astype(o_ref.dtype)

        @pl.when(k == 4)
        def _():
            o_ref[0] = (y * jax.nn.sigmoid(y)).astype(o_ref.dtype)


def _derive_block_s(S, D, resident_bytes, itemsize=4):
    """Largest seq tile whose double-buffered x/out streams fit the VMEM budget."""
    stream_budget = max(VMEM_BUDGET - resident_bytes, 4 << 20)
    # x and out are each double-buffered [block_s, D] tiles of `itemsize` bytes.
    max_bs = max(8, stream_budget // (4 * D * itemsize))
    if S <= max_bs:
        return S
    bs = min(S, (max_bs // 8) * 8)
    while bs > 8 and S % bs:
        bs -= 8
    return bs if (bs >= 8 and S % bs == 0) else S


def esnode_forward(xs, w_full, b_full, sel, *, block_s=None):
    """xs: [ni,B,S,D] f32, w_full: [ni*NACT,D,D] bf16, b_full: [ni*NACT,1,D] f32, sel: [B] int32."""
    ni, B, S, D = xs.shape
    assert w_full.shape == (ni * NACT, D, D) and b_full.shape == (ni * NACT, 1, D)

    w_bytes = w_full.size * w_full.dtype.itemsize
    b_bytes = b_full.size * b_full.dtype.itemsize
    resident = 2 * (w_bytes + b_bytes)          # BlockSpec double-buffers once

    if block_s is None:
        block_s = _derive_block_s(S, D, resident, xs.dtype.itemsize)
    assert S % block_s == 0 and (block_s == S or block_s % 8 == 0)
    n_s = S // block_s

    # Precompute all per-batch scalar indices once in XLA so the index_maps and
    # the kernel body do no div/mod/clip on the scalar unit.
    sel = jnp.clip(sel.astype(jnp.int32), 0, ni * NOP - 1)   # guard OOB samples
    edge = (sel // NOP).astype(jnp.int32)
    op = (sel % NOP).astype(jnp.int32)
    widx = (edge * NACT + jnp.clip(op - 2, 0, NACT - 1)).astype(jnp.int32)

    def x_map(i, s, edge_s, op_s, widx_s):
        return (edge_s[i], i, s, 0)

    def res_map(i, s, *_):                      # resident weights/bias: constant block
        return (0, 0, 0)

    def o_map(i, s, *_):
        return (i, s, 0)

    grid_spec = pltpu.PrefetchScalarGridSpec(
        num_scalar_prefetch=3,
        grid=(B, n_s),
        in_specs=[
            pl.BlockSpec((1, 1, block_s, D), x_map),
            pl.BlockSpec((ni * NACT, D, D), res_map),   # whole w resident in VMEM
            pl.BlockSpec((ni * NACT, 1, D), res_map),   # whole b resident in VMEM
        ],
        out_specs=pl.BlockSpec((1, block_s, D), o_map),
    )

    # Needed VMEM: resident weights + double-buffered x/out tiles (+ headroom).
    needed = resident + 4 * block_s * D * xs.dtype.itemsize
    vmem_limit = int(min(max(needed + (8 << 20), 32 << 20), 64 << 20))

    cost = pl.CostEstimate(
        flops=2 * B * S * D * D,                # upper bound: every step matmuls
        transcendentals=B * S * D,
        bytes_accessed=2 * B * S * D * xs.dtype.itemsize + w_bytes + b_bytes,
    )

    return pl.pallas_call(
        _esnode_kernel,
        out_shape=jax.ShapeDtypeStruct((B, S, D), xs.dtype),
        grid_spec=grid_spec,
        cost_estimate=cost,
        compiler_params=pltpu.CompilerParams(
            dimension_semantics=("parallel", "parallel"),
            vmem_limit_bytes=vmem_limit,
        ),
    )(edge, op, widx, xs, w_full, b_full)


def reference(xs, W, b, sel):
    """Pure-JAX replica of the PyTorch ESNode training forward (given samples)."""
    ni, B, S, D = xs.shape
    zero = jnp.zeros_like(xs[0])
    cands = []
    for e in range(ni):
        x = xs[e]
        y = jnp.einsum("bsd,od->bso", x, W[e]) + b[e]        # Linear: [B,S,5D]
        y5 = y.reshape(B, S, D, NACT)                        # .view(*, isize, 5)
        acts = [
            jax.nn.sigmoid(y5[..., 0]),
            jnp.tanh(y5[..., 1]),
            jnp.maximum(y5[..., 2], 0.0),
            _gelu(y5[..., 3]),
            y5[..., 4] * jax.nn.sigmoid(y5[..., 4]),
        ]
        cands += [zero, x] + acts                            # [Zero, Identity, 5 acts]
    stacked = jnp.stack(cands, axis=1)                       # [B, ni*NOP, S, D]
    return stacked[jnp.arange(B), sel]                       # EffSampler gather


if __name__ == "__main__":
    # D a multiple of 128 and block_s >= 256 keep the MXU and output stores
    # lane-dense while the total problem stays tiny (~1 MB of activations).
    NI, B, S, D = 2, 4, 256, 128

    key = jax.random.PRNGKey(0)
    k_x, k_w, k_b, k_s = jax.random.split(key, 4)

    # inputs: one per incoming edge, stacked as [ni, B, S, D]
    xs = jax.random.normal(k_x, (NI, B, S, D), jnp.float32)

    # Edge.trans parameters (Linear(isize, isize*5)) per edge
    W = jax.random.normal(k_w, (NI, NACT * D, D), jnp.float32) * 0.1
    b = jax.random.normal(k_b, (NI, NACT * D), jnp.float32) * 0.01

    # Node.weight (architecture logits) zero-init (fix_init) -> uniform softmax.
    arch_weight = jnp.zeros((NI * NOP,), jnp.float32)

    # EffSampler: per-batch-element categorical sample over softmax(arch_weight)
    sel = jax.random.categorical(
        k_s, jnp.broadcast_to(arch_weight, (B, NI * NOP)), axis=-1
    ).astype(jnp.int32)

    # Undo the interleaved `.view(..., D, 5).unbind(-1)` split so each
    # activation k owns a contiguous kernel-ready [D_in, D_out] slab, flatten
    # (edge, k) into one leading axis, and down-cast weights to bf16
    # (halved footprint, bf16 MXU; accumulation stays f32).
    w_full = (W.reshape(NI, D, NACT, D)       # [e, d_out, k, d_in]
                .transpose(0, 2, 3, 1)        # [e, k, d_in, d_out]
                .reshape(NI * NACT, D, D)
                .astype(jnp.bfloat16))
    b_full = (b.reshape(NI, D, NACT)          # [e, d_out, k]
                .transpose(0, 2, 1)           # [e, k, d_out]
                .reshape(NI * NACT, 1, D)
                .astype(jnp.float32))

    out = esnode_forward(xs, w_full, b_full, sel)
    out = jax.block_until_ready(out)

    ref = reference(xs, W, b, sel)
    assert out.shape == (B, S, D) and out.dtype == jnp.float32
    # bf16 weights in the kernel vs f32 reference -> relaxed tolerance.
    max_err = float(jnp.max(jnp.abs(out - ref)))
    assert jnp.allclose(out, ref, atol=5e-2, rtol=5e-2), (
        f"mismatch vs reference (max abs err {max_err})")
    print("KERNEL_OK")
</pallas_src>

<mosaic_0001>
module attributes {stable_mosaic.version = 11 : i64} {
  func.func @_esnode_kernel(%arg0: i32, %arg1: i32, %arg2: memref<4xi32, #tpu.memory_space<smem>>, %arg3: memref<4xi32, #tpu.memory_space<smem>>, %arg4: memref<4xi32, #tpu.memory_space<smem>>, %arg5: memref<1x1x256x128xf32, #tpu.memory_space<vmem>>, %arg6: memref<10x128x128xbf16, #tpu.memory_space<vmem>>, %arg7: memref<10x1x128xf32, #tpu.memory_space<vmem>>, %arg8: memref<1x256x128xf32, #tpu.memory_space<vmem>>) attributes {dimension_semantics = [#tpu.dimension_semantics<parallel>, #tpu.dimension_semantics<parallel>], iteration_bounds = array<i64: 4, 1>, scalar_prefetch = 3 : i64, scratch_operands = 0 : i64, tpu.core_type = #tpu.core_type<tc>, window_params = [{transform_indices = @transform_0, window_bounds = array<i64: 1, 1, 256, 128>}, {pipeline_mode = #tpu.pipeline_mode<synchronous>, transform_indices = @transform_1, window_bounds = array<i64: 10, 128, 128>}, {pipeline_mode = #tpu.pipeline_mode<synchronous>, transform_indices = @transform_2, window_bounds = array<i64: 10, 1, 128>}, {transform_indices = @transform_3, window_bounds = array<i64: 1, 256, 128>}]} {
    %0 = arith.index_cast %arg0 : i32 to index
    %1 = memref.load %arg3[%0] : memref<4xi32, #tpu.memory_space<smem>>
    %c0_i32 = arith.constant 0 : i32
    %2 = arith.cmpi eq, %1, %c0_i32 : i32
    %3 = arith.extui %2 : i1 to i32
    %c0_i32_0 = arith.constant 0 : i32
    %4 = arith.cmpi ne, %3, %c0_i32_0 : i32
    scf.if %4 {
      %cst = arith.constant 0.000000e+00 : f32
      %11 = vector.broadcast %cst : f32 to vector<1x256x128xf32>
      %c0 = arith.constant 0 : index
      %c0_3 = arith.constant 0 : index
      %c0_4 = arith.constant 0 : index
      %12 = vector.load %arg8[%c0, %c0_3, %c0_4] : memref<1x256x128xf32, #tpu.memory_space<vmem>>, vector<1x256x128xf32>
      tpu.vector_store %arg8[%c0, %c0_3, %c0_4], %11 {strides = array<i32>} : memref<1x256x128xf32, #tpu.memory_space<vmem>>, vector<1x256x128xf32>,
    } else {
    }
    %c1_i32 = arith.constant 1 : i32
    %5 = arith.cmpi eq, %1, %c1_i32 : i32
    %6 = arith.extui %5 : i1 to i32
    %c0_i32_1 = arith.constant 0 : i32
    %7 = arith.cmpi ne, %6, %c0_i32_1 : i32
    scf.if %7 {
      %c0 = arith.constant 0 : index
      %c0_3 = arith.constant 0 : index
      %c0_4 = arith.constant 0 : index
      %c0_5 = arith.constant 0 : index
      %11 = vector.load %arg5[%c0, %c0_3, %c0_4, %c0_5] : memref<1x1x256x128xf32, #tpu.memory_space<vmem>>, vector<1x1x256x128xf32>
      %12 = vector.shape_cast %11 : vector<1x1x256x128xf32> to vector<1x256x128xf32>
      %c0_6 = arith.constant 0 : index
      %c0_7 = arith.constant 0 : index
      %c0_8 = arith.constant 0 : index
      %13 = vector.load %arg8[%c0_6, %c0_7, %c0_8] : memref<1x256x128xf32, #tpu.memory_space<vmem>>, vector<1x256x128xf32>
      tpu.vector_store %arg8[%c0_6, %c0_7, %c0_8], %12 {strides = array<i32>} : memref<1x256x128xf32, #tpu.memory_space<vmem>>, vector<1x256x128xf32>,
    } else {
    }
    %c2_i32 = arith.constant 2 : i32
    %8 = arith.cmpi sge, %1, %c2_i32 : i32
    %9 = arith.extui %8 : i1 to i32
    %c0_i32_2 = arith.constant 0 : i32
    %10 = arith.cmpi ne, %9, %c0_i32_2 : i32
    scf.if %10 {
      %c0 = arith.constant 0 : index
      %c0_3 = arith.constant 0 : index
      %c0_4 = arith.constant 0 : index
      %c0_5 = arith.constant 0 : index
      %11 = vector.load %arg5[%c0, %c0_3, %c0_4, %c0_5] : memref<1x1x256x128xf32, #tpu.memory_space<vmem>>, vector<1x1x256x128xf32>
      %12 = vector.shape_cast %11 : vector<1x1x256x128xf32> to vector<256x128xf32>
      %13 = arith.index_cast %arg0 : i32 to index
      %14 = memref.load %arg4[%13] : memref<4xi32, #tpu.memory_space<smem>>
      %15 = arith.index_cast %14 : i32 to index
      %c0_6 = arith.constant 0 : index
      %c0_7 = arith.constant 0 : index
      %16 = vector.load %arg6[%15, %c0_6, %c0_7] : memref<10x128x128xbf16, #tpu.memory_space<vmem>>, vector<1x128x128xbf16>
      %17 = vector.shape_cast %16 : vector<1x128x128xbf16> to vector<128x128xbf16>
      %18 = arith.index_cast %14 : i32 to index
      %c0_8 = arith.constant 0 : index
      %c0_9 = arith.constant 0 : index
      %19 = vector.load %arg7[%18, %c0_8, %c0_9] : memref<10x1x128xf32, #tpu.memory_space<vmem>>, vector<1x1x128xf32>
      %20 = vector.shape_cast %19 : vector<1x1x128xf32> to vector<1x128xf32>
      %21 = arith.truncf %12 : vector<256x128xf32> to vector<256x128xbf16>
      %cst = arith.constant dense<0.000000e+00> : vector<256x128xf32>
      %22 = tpu.matmul %21, %17, %cst {dimension_numbers = #tpu.dot_dimension_numbers<[1], [0], [0], [1], [0, 0, 1, 1], [], []>} : vector<256x128xbf16>, vector<128x128xbf16>, vector<256x128xf32> -> vector<256x128xf32>
      %23 = vector.broadcast %20 : vector<1x128xf32> to vector<256x128xf32>
      %24 = arith.addf %22, %23 : vector<256x128xf32>
      %c2_i32_10 = arith.constant 2 : i32
      %25 = arith.subi %1, %c2_i32_10 : i32
      %c0_i32_11 = arith.constant 0 : i32
      %26 = arith.cmpi eq, %25, %c0_i32_11 : i32
      %27 = arith.extui %26 : i1 to i32
      %c0_i32_12 = arith.constant 0 : i32
      %28 = arith.cmpi ne, %27, %c0_i32_12 : i32
      scf.if %28 {
        %41 = arith.negf %24 : vector<256x128xf32>
        %42 = math.exp %41 : vector<256x128xf32>
        %cst_19 = arith.constant 1.000000e+00 : f32
        %43 = vector.broadcast %cst_19 : f32 to vector<256x128xf32>
        %44 = arith.addf %43, %42 : vector<256x128xf32>
        %45 = arith.divf %43, %44 : vector<256x128xf32>
        %c0_20 = arith.constant 0 : index
        %c0_21 = arith.constant 0 : index
        %c0_22 = arith.constant 0 : index
        %46 = vector.load %arg8[%c0_20, %c0_21, %c0_22] : memref<1x256x128xf32, #tpu.memory_space<vmem>>, vector<1x256x128xf32>
        %47 = vector.shape_cast %46 : vector<1x256x128xf32> to vector<256x128xf32>
        %48 = vector.shape_cast %45 : vector<256x128xf32> to vector<1x256x128xf32>
        tpu.vector_store %arg8[%c0_20, %c0_21, %c0_22], %48 {strides = array<i32>} : memref<1x256x128xf32, #tpu.memory_space<vmem>>, vector<1x256x128xf32>,
      } else {
      }
      %c1_i32_13 = arith.constant 1 : i32
      %29 = arith.cmpi eq, %25, %c1_i32_13 : i32
      %30 = arith.extui %29 : i1 to i32
      %c0_i32_14 = arith.constant 0 : i32
      %31 = arith.cmpi ne, %30, %c0_i32_14 : i32
      scf.if %31 {
        %41 = math.tanh %24 : vector<256x128xf32>
        %c0_19 = arith.constant 0 : index
        %c0_20 = arith.constant 0 : index
        %c0_21 = arith.constant 0 : index
        %42 = vector.load %arg8[%c0_19, %c0_20, %c0_21] : memref<1x256x128xf32, #tpu.memory_space<vmem>>, vector<1x256x128xf32>
        %43 = vector.shape_cast %42 : vector<1x256x128xf32> to vector<256x128xf32>
        %44 = vector.shape_cast %41 : vector<256x128xf32> to vector<1x256x128xf32>
        tpu.vector_store %arg8[%c0_19, %c0_20, %c0_21], %44 {strides = array<i32>} : memref<1x256x128xf32, #tpu.memory_space<vmem>>, vector<1x256x128xf32>,
      } else {
      }
      %c2_i32_15 = arith.constant 2 : i32
      %32 = arith.cmpi eq, %25, %c2_i32_15 : i32
      %33 = arith.extui %32 : i1 to i32
      %c0_i32_16 = arith.constant 0 : i32
      %34 = arith.cmpi ne, %33, %c0_i32_16 : i32
      scf.if %34 {
        %cst_19 = arith.constant 0.000000e+00 : f32
        %41 = vector.broadcast %cst_19 : f32 to vector<256x128xf32>
        %42 = arith.maximumf %24, %41 : vector<256x128xf32>
        %c0_20 = arith.constant 0 : index
        %c0_21 = arith.constant 0 : index
        %c0_22 = arith.constant 0 : index
        %43 = vector.load %arg8[%c0_20, %c0_21, %c0_22] : memref<1x256x128xf32, #tpu.memory_space<vmem>>, vector<1x256x128xf32>
        %44 = vector.shape_cast %43 : vector<1x256x128xf32> to vector<256x128xf32>
        %45 = vector.shape_cast %42 : vector<256x128xf32> to vector<1x256x128xf32>
        tpu.vector_store %arg8[%c0_20, %c0_21, %c0_22], %45 {strides = array<i32>} : memref<1x256x128xf32, #tpu.memory_space<vmem>>, vector<1x256x128xf32>,
      } else {
      }
      %c3_i32 = arith.constant 3 : i32
      %35 = arith.cmpi eq, %25, %c3_i32 : i32
      %36 = arith.extui %35 : i1 to i32
      %c0_i32_17 = arith.constant 0 : i32
      %37 = arith.cmpi ne, %36, %c0_i32_17 : i32
      scf.if %37 {
        %cst_19 = arith.constant 0.636619746 : f32
        %41 = math.sqrt %cst_19 : f32
        %cst_20 = arith.constant 5.000000e-01 : f32
        %42 = vector.broadcast %cst_20 : f32 to vector<256x128xf32>
        %43 = arith.mulf %42, %24 : vector<256x128xf32>
        %cst_21 = arith.constant 4.471500e-02 : f32
        %44 = vector.broadcast %cst_21 : f32 to vector<256x128xf32>
        %45 = arith.mulf %44, %24 : vector<256x128xf32>
        %46 = arith.mulf %45, %24 : vector<256x128xf32>
        %47 = arith.mulf %46, %24 : vector<256x128xf32>
        %48 = arith.addf %24, %47 : vector<256x128xf32>
        %49 = vector.broadcast %41 : f32 to vector<256x128xf32>
        %50 = arith.mulf %49, %48 : vector<256x128xf32>
        %51 = math.tanh %50 : vector<256x128xf32>
        %cst_22 = arith.constant 1.000000e+00 : f32
        %52 = vector.broadcast %cst_22 : f32 to vector<256x128xf32>
        %53 = arith.addf %52, %51 : vector<256x128xf32>
        %54 = arith.mulf %43, %53 : vector<256x128xf32>
        %c0_23 = arith.constant 0 : index
        %c0_24 = arith.constant 0 : index
        %c0_25 = arith.constant 0 : index
        %55 = vector.load %arg8[%c0_23, %c0_24, %c0_25] : memref<1x256x128xf32, #tpu.memory_space<vmem>>, vector<1x256x128xf32>
        %56 = vector.shape_cast %55 : vector<1x256x128xf32> to vector<256x128xf32>
        %57 = vector.shape_cast %54 : vector<256x128xf32> to vector<1x256x128xf32>
        tpu.vector_store %arg8[%c0_23, %c0_24, %c0_25], %57 {strides = array<i32>} : memref<1x256x128xf32, #tpu.memory_space<vmem>>, vector<1x256x128xf32>,
      } else {
      }
      %c4_i32 = arith.constant 4 : i32
      %38 = arith.cmpi eq, %25, %c4_i32 : i32
      %39 = arith.extui %38 : i1 to i32
      %c0_i32_18 = arith.constant 0 : i32
      %40 = arith.cmpi ne, %39, %c0_i32_18 : i32
      scf.if %40 {
        %41 = arith.negf %24 : vector<256x128xf32>
        %42 = math.exp %41 : vector<256x128xf32>
        %cst_19 = arith.constant 1.000000e+00 : f32
        %43 = vector.broadcast %cst_19 : f32 to vector<256x128xf32>
        %44 = arith.addf %43, %42 : vector<256x128xf32>
        %45 = arith.divf %43, %44 : vector<256x128xf32>
        %46 = arith.mulf %24, %45 : vector<256x128xf32>
        %c0_20 = arith.constant 0 : index
        %c0_21 = arith.constant 0 : index
        %c0_22 = arith.constant 0 : index
        %47 = vector.load %arg8[%c0_20, %c0_21, %c0_22] : memref<1x256x128xf32, #tpu.memory_space<vmem>>, vector<1x256x128xf32>
        %48 = vector.shape_cast %47 : vector<1x256x128xf32> to vector<256x128xf32>
        %49 = vector.shape_cast %46 : vector<256x128xf32> to vector<1x256x128xf32>
        tpu.vector_store %arg8[%c0_20, %c0_21, %c0_22], %49 {strides = array<i32>} : memref<1x256x128xf32, #tpu.memory_space<vmem>>, vector<1x256x128xf32>,
      } else {
      }
    } else {
    }
    return
  }
  func.func @transform_0(%arg0: i32, %arg1: i32, %arg2: memref<4xi32, #tpu.memory_space<smem>>, %arg3: memref<4xi32, #tpu.memory_space<smem>>, %arg4: memref<4xi32, #tpu.memory_space<smem>>) -> (i32, i32, i32, i32) {
    %0 = arith.index_cast %arg0 : i32 to index
    %1 = memref.load %arg2[%0] : memref<4xi32, #tpu.memory_space<smem>>
    %c0_i32 = arith.constant 0 : i32
    %c0_i32_0 = arith.constant 0 : i32
    return %1, %arg0, %arg1, %c0_i32 : i32, i32, i32, i32
  }
  func.func @transform_1(%arg0: i32, %arg1: i32, %arg2: memref<4xi32, #tpu.memory_space<smem>>, %arg3: memref<4xi32, #tpu.memory_space<smem>>, %arg4: memref<4xi32, #tpu.memory_space<smem>>) -> (i32, i32, i32) {
    %c0_i32 = arith.constant 0 : i32
    %c0_i32_0 = arith.constant 0 : i32
    %c0_i32_1 = arith.constant 0 : i32
    %c0_i32_2 = arith.constant 0 : i32
    return %c0_i32, %c0_i32_0, %c0_i32_1 : i32, i32, i32
  }
  func.func @transform_2(%arg0: i32, %arg1: i32, %arg2: memref<4xi32, #tpu.memory_space<smem>>, %arg3: memref<4xi32, #tpu.memory_space<smem>>, %arg4: memref<4xi32, #tpu.memory_space<smem>>) -> (i32, i32, i32) {
    %c0_i32 = arith.constant 0 : i32
    %c0_i32_0 = arith.constant 0 : i32
    %c0_i32_1 = arith.constant 0 : i32
    %c0_i32_2 = arith.constant 0 : i32
    return %c0_i32, %c0_i32_0, %c0_i32_1 : i32, i32, i32
  }
  func.func @transform_3(%arg0: i32, %arg1: i32, %arg2: memref<4xi32, #tpu.memory_space<smem>>, %arg3: memref<4xi32, #tpu.memory_space<smem>>, %arg4: memref<4xi32, #tpu.memory_space<smem>>) -> (i32, i32, i32) {
    %c0_i32 = arith.constant 0 : i32
    %c0_i32_0 = arith.constant 0 : i32
    return %arg0, %arg1, %c0_i32 : i32, i32, i32
  }
}

</mosaic_0001>

<bundles_post_ra>
// kernel: tpu_custom_call.1
= control target key start
LH: loop header
LB: loop body
LE: loop exit
PB: predicated region body
PF: predicated region fallthrough
CT: control target
= control target key end

     0   :  { %s2665_s21 = smov [#allocation3]   ;;  %s3728_s0 = inlined_call_operand.hbm [shape: s32[4], index: 0, kind: input, shape index: {}]   ;;  %s3729_s3 = inlined_call_operand.hbm [shape: f32[2,4,256,128], index: 3, kind: input, shape index: {}]   ;;  %s3730_s4 = inlined_call_operand.hbm [shape: bf16[10,128,128], index: 4, kind: input, shape index: {}]   ;;  %s3731_s5 = inlined_call_operand.hbm [shape: f32[10,1,128], index: 5, kind: input, shape index: {}]   ;;  %s3732_s6 = inlined_call_operand.hbm [shape: f32[4,256,128], index: 6, kind: output, shape index: {}]   ;;  %s3733_s1 = inlined_call_operand.vmem [shape: s32[4], index: 1, kind: input, shape index: {}]   ;;  %s3734_s2 = inlined_call_operand.vmem [shape: s32[4], index: 2, kind: input, shape index: {}]  }
   0x1   :  { %3743 = sst [smem:[#allocation23_spill]] %s3730_s4  ;;  %s13_s26 = sshll.u32 %s3733_s1, 4  ;;  %s14_s26 = int_to_ptr.vmem [resolvable:$true] %s13_s26 }
   0x2   :  { %3744 = sst [smem:[#allocation24_spill]] %s3731_s5  ;;  %s17_s29 = sshll.u32 %s3734_s2, 4  ;;  %s18_s29 = int_to_ptr.vmem [resolvable:$true] %s17_s29 }
   0x3   :  { %12 = dma.hbm_to_smem %s3728_s0, 16, %s2665_s21, [#allocation2] }
   0x4   :  { %s2449_s30 = scalar_lea.vmem %s14_s26, 16  ;;  %p2454_p1 = scmp.lt.s32.totalorder %s14_s26, %s14_s26 }
   0x5   :  { %p2450_p0 = scmp.ne.s32.totalorder %s14_s26, %s2449_s30  ;;  %p2455_p2 = scmp.lt.s32.totalorder %s2449_s30, %s2449_s30 }
   0x7   :  { %p2456_p3 = por %p2455_p2, %p2454_p1 }
   0x9   :  { %p2457_p4 = pnand %p2456_p3, %p2450_p0 }
   0xb   :  { %2460 = shalt.err (!%p2457_p4)  }
   0xc   :  { %s2666_s7 = smov [#allocation4]   ;;  %s2461_s0 = scalar_lea.vmem %s18_s29, 16 }
   0xd   :  { %16 = dma.vmem_to_smem %s14_s26, 16, %s2666_s7, [#allocation2] }
   0xe   :  { %p2462_p5 = scmp.ne.s32.totalorder %s18_s29, %s2461_s0  ;;  %p2466_p6 = scmp.lt.s32.totalorder %s18_s29, %s18_s29 }
   0xf   :  { %p2467_p7 = scmp.lt.s32.totalorder %s2461_s0, %s2461_s0 }
  0x11   :  { %p2468_p8 = por %p2467_p7, %p2466_p6 }
  0x13   :  { %p2469_p9 = pnand %p2468_p8, %p2462_p5 }
  0x15   :  { %2472 = shalt.err (!%p2469_p9)  }
  0x16   :  { %s2667_s1 = smov [#allocation5]  }
  0x17   :  { %20 = dma.vmem_to_smem %s18_s29, 16, %s2667_s1, [#allocation2] }
  0x18   :  { %2615 = dma.done.wait [#allocation2], 48 }
  0x19   :  { %2616 = vsyncadd [#allocation2], 4294967248 }
  0x1a   :  { %22 = sfence }
  0x1b   :  { %23 = vsyncpa [#allocation7], 0 }
  0x1c   :  { %25 = vsyncpa [#allocation7 + $0x1], 0 }
  0x1d   :  { %26 = vsyncpa [#allocation10], 0 }
  0x1e   :  { %27 = vsyncpa [#allocation8], 0 }
  0x1f   :  { %29 = vsyncpa [#allocation8 + $0x1], 0  ;;  %s2725_s2 = smov 0   ;;  %s2727_s8 = smov 0  }
  0x20   :  { %s2729_s9 = smov 0   ;;  %s2731_s10 = smov 0  }
  0x21   :  { %s2733_s11 = smov 0   ;;  %s2735_s12 = smov 0  }
  0x22   :  { %s2737_s13 = smov 0   ;;  %s2739_s14 = smov 0  }
  0x23   :  { %s2741_s15 = smov 0  }
  0x24 LB: > { %3745 = sst [smem:[#allocation19_spill]] %s2639_s9  ;;  %s1732_s16 = sadd.s32 4294967295, %s2663_s15   ;;  %s2663_s15 = sphi %s2741_s15, %s35_s15   ;;  %s2659_s14 = sphi %s2739_s14, %s3774_s14   ;;  %s2655_s13 = sphi %s2737_s13, %s3773_s13   ;;  %s2651_s12 = sphi %s2735_s12, %s3772_s12   ;;  %s2647_s11 = sphi %s2733_s11, %s3771_s11   ;;  %s2643_s10 = sphi %s2731_s10, %s3770_s10   ;;  %s2639_s9 = sphi %s2729_s9, %s3766_s9   ;;  %s2635_s8 = sphi %s2727_s8, %s3769_s8   ;;  %s2631_s2 = sphi %s2725_s2, %s3768_s2  }
  0x25   : > { %s1733_s17 = sadd.s32 4294967294, %s2663_s15   ;;  %p73_p10 = scmp.ne.s32.totalorder %s2647_s11, %s2643_s10 }
  0x26   : > { %p2771_p11 = scmp.eq.s32.totalorder %s1732_s16, 0  ;;  %p140_p12 = scmp.ne.s32.totalorder %s2639_s9, %s2635_s8 }
  0x27   : > { %p141_p0 = scmp.eq.s32.totalorder %s1732_s16, 3  ;;  %p146_p1 = scmp.ne.s32.totalorder %s2635_s8, %s2631_s2 }
  0x28   : > { %s3746_s18 = scalar_select %p2771_p11, 1, 0 }
  0x29   : > { %p2779_p13 = por %p2771_p11, %p73_p10  ;;  %p147_p2 = scmp.eq.s32.totalorder %s1733_s17, 3 }
  0x2a   : > { %p2785_p3 = por %p141_p0, %p140_p12  ;;  %p1734_p4 = scmp.ge.s32.totalorder %s2663_s15, 1 }
  0x2b   : > { %s3747_s19 = scalar_select %p2779_p13, 1, 0 }
  0x2c   : > { %s3748_s20 = scalar_select %p2785_p3, 1, 0 }
  0x2d   : > { %p2790_p5 = por %p147_p2, %p146_p1  ;;  %p154_p6 = scmp.lt.s32.totalorder %s2663_s15, 5 }
  0x2e   : > { %s2668_s23 = smov [#allocation9]   ;;  %s2669_s26 = smov [#allocation11]  }
  0x2f   : > { %s3749_s21 = scalar_select %p2790_p5, 1, 0 }
  0x30   : > { %p2795_p7 = pnand %p1734_p4, %p154_p6  ;;  %s166_s24 = sshll.u32 %s2668_s23, 4  ;;  %s167_s24 = int_to_ptr.vmem [resolvable:$true] %s166_s24 }
  0x31   : > { %3750 = sst [smem:[#allocation20_spill]] %s3749_s21  ;;  %s179_s27 = sshll.u32 %s2669_s26, 4  ;;  %s180_s27 = int_to_ptr.vmem [resolvable:$true] %s179_s27 }
  0x32   : > { %s3751_s22 = scalar_select %p2795_p7, 1, 0 }
  0x33   : > { %p1940_p8 = pneg %p2795_p7  ;;  %s2484_s28 = scalar_lea.vmem %s167_s24, 10240 }
  0x34   : > { %p2485_p12 = scmp.ne.s32.totalorder %s167_s24, %s2484_s28  ;;  %p2492_p2 = scmp.lt.s32.totalorder %s167_s24, %s167_s24 }
  0x35   : > { %p2803_p9 = pnand %p1940_p8, %p2771_p11  ;;  %p2493_p4 = scmp.lt.s32.totalorder %s2484_s28, %s2484_s28 }
  0x37   : > { %p2475_p10 = pneg %p2803_p9  ;;  %p2494_p6 = por %p2493_p4, %p2492_p2 }
  0x39   : > { %p2487_p0 = pnand %p2485_p12, %p2475_p10 }
  0x3b   : > { %p2488_p1 = pneg %p2487_p0 }
  0x3d   : > { %p2495_p8 = pnand %p2494_p6, %p2488_p1 }
  0x3f   : > { %2498 = shalt.err (!%p2495_p8)
}
  0x40   : > { %s2670_s29 = smov 64   ;;  %s2671_s30 = smov 4  }
  0x41   : > { %s3753_s4 = sld [smem:[#allocation23_spill]]  ;;  %s2510_s1 = scalar_lea.vmem %s180_s27, 160 }
  0x42   : > { %p2511_p5 = scmp.ne.s32.totalorder %s180_s27, %s2510_s1  ;;  %p2518_p3 = scmp.lt.s32.totalorder %s180_s27, %s180_s27 }
  0x43   : > { %p2519_p11 = scmp.lt.s32.totalorder %s2510_s1, %s2510_s1 }
  0x44   : > { %p2513_p12 = pnand %p2511_p5, %p2475_p10 }
  0x45   : > { %p2520_p2 = por %p2519_p11, %p2518_p3 }
  0x46   : > { %p2514_p0 = pneg %p2513_p12 }
  0x47   : > { %1943 = dma.hbm_to_vmem [thread:$0]  (!%p2803_p9), %s3753_s4, 10240, %s167_s24, [#allocation10], %s2670_s29, %s2670_s29, %s2671_s30  }
  0x48   : > { %p2521_p1 = pnand %p2520_p2, %p2514_p0 }
  0x4a   : > { %2524 = shalt.err (!%p2521_p1)
}
  0x4b   : > { %s2672_s10 = smov 16   ;;  %s2673_s16 = smov 1  }
  0x4c   : > { %s3754_s5 = sld [smem:[#allocation24_spill]]  ;;  %s47_s24 = sadd.s32 1, %s2659_s14 }
  0x4d   : > { %p49_p11 = scmp.ge.s32.totalorder %s47_s24, 4  ;;  %s51_s26 = sld [smem:[#allocation3 + %s2659_s14]] }
  0x4e   : > { %p67_p3 = scmp.ne.s32.totalorder %s2651_s12, %s2647_s11  ;;  %p68_p5 = scmp.eq.s32.totalorder %s2663_s15, 0 }
  0x4f   : > { %s3776_s24 = smov (%p49_p11, %s47_s24), 0  ;;  %s130_s28 = sadd.s32 1, %s2639_s9 }
  0x50   : > { %3755 = sst [smem:[#allocation21_spill]] %s3776_s24  ;;  %s54_s30 = ssub.s32 %s2659_s14, %s3776_s24 }
  0x51   : > { %s52_s29 = sld [smem:[#allocation3 + %s3776_s24]]  ;;  %p2836_p10 = por %p68_p5, %p67_p3 }
  0x52   : > { %1946 = dma.hbm_to_vmem [thread:$0]  (!%p2803_p9), %s3754_s5, 160, %s180_s27, [#allocation10], %s2672_s10, %s2672_s10, %s2673_s16  }
  0x53   : > { %p128_p9 = scmp.eq.s32.totalorder %s54_s30, 0  ;;  %s60_s7 = sadd.s32 1, %s2651_s12 }
  0x54   : > { %s193_s0 = sand.u32 1, %s2651_s12   ;;  %p1959_p4 = scmp.lt.s32.totalorder %s2663_s15, 4 }
  0x55   : > { %s2841_s27 = scalar_select %p128_p9, %s2639_s9, %s130_s28  }
  0x56   : > { %s1930_s1 = scalar_select %p2836_p10, [#allocation3], [#allocation13] }
  0x57   : > { %3757 = sst [smem:[#allocation22_spill]] %s2841_s27  ;;  %s53_s10 = ssub.s32 %s51_s26, %s52_s29 }
  0x58   : > { %s55_s16 = sor.u32 %s54_s30, %s53_s10  ;;  %s1738_s17 = sshll.u32 %s193_s0, 8 }
  0x59   : > { %p58_p6 = scmp.eq.s32.totalorder %s55_s16, 0  ;;  %p2850_p8 = pnand %p1959_p4, %p2836_p10 }
  0x5a   : > { %s1931_s4 = scalar_select %p2836_p10, %s2659_s14, 0 }
  0x5b   : > { %s2858_s28 = scalar_select %p58_p6, %s2651_s12, %s60_s7  }
  0x5c   : > { %s3778_s1 = smov (!%p1959_p4, %s1930_s1), [#allocation14]  ;;  %s3780_s4 = smov (!%p1959_p4, %s1931_s4), 0 }
  0x5d   : > { %s198_s5 = sld [smem:[%s3778_s1 + %s3780_s4]]  ;;  %s197_s24 = scalar_lea.vmem [#allocation6], %s1738_s17 }
  0x5e   : > { %s209_s27 = sshll.u32 %s197_s24, 4  ;;  %s1739_s26 = sshll.u32 %s2659_s14, 5  ;;  %s2861_s27 = int_to_ptr.vmem [resolvable:$true] %s209_s27 }
  0x5f   : > { %s2868_s25 = scalar_lea.sflag [#allocation7], %s193_s0  ;;  %p2527_p0 = pneg %p2850_p8 }
  0x60   : > { %s2530_s24 = scalar_lea.hbm %s3729_s3, 32768 }
  0x63   : > { %s1740_s29 = sshll.u32 %s198_s5, 7 }
  0x64   : > { %s206_s30 = sadd.s32 %s1740_s29, %s1739_s26 }
  0x65   : > { %s1741_s10 = sshll.u32 %s206_s30, 7 }
  0x66   : > { %s2866_s21 = scalar_lea.hbm %s3729_s3, %s1741_s10 }
  0x67   : > { %s2525_s7 = scalar_lea.hbm %s2866_s21, 4096  ;;  %p2531_p11 = scmp.lt.s32.totalorder %s2866_s21, %s3729_s3 }
  0x68   : > { %p2526_p12 = scmp.ne.s32.totalorder %s2866_s21, %s2525_s7  ;;  %p2532_p3 = scmp.lt.s32.totalorder %s2530_s24, %s2525_s7 }
  0x6a   : > { %p2528_p2 = pnand %p2527_p0, %p2526_p12  ;;  %p2533_p5 = por %p2532_p3, %p2531_p11 }
  0x6c   : > { %p2529_p1 = pneg %p2528_p2 }
  0x6e   : > { %p2534_p10 = pnand %p2533_p5, %p2529_p1 }
  0x70   : > { %2537 = shalt.err (!%p2534_p10)
}
  0x71   : > { %s2538_s9 = scalar_lea.vmem %s2861_s27, 4096  ;;  %s2674_s0 = smov [#allocation6]  }
  0x72   : > { %p2539_p9 = scmp.ne.s32.totalorder %s2861_s27, %s2538_s9  ;;  %s2543_s26 = sshll.u32 %s2674_s0, 4  ;;  %s2544_s26 = int_to_ptr.vmem [resolvable:$false] %s2543_s26 }
  0x73   : > { %s2545_s29 = scalar_lea.vmem %s2544_s26, 8192  ;;  %p2546_p12 = scmp.lt.s32.totalorder %s2861_s27, %s2544_s26 }
  0x74   : > { %p2541_p4 = pnand %p2539_p9, %p2527_p0  ;;  %p2547_p2 = scmp.lt.s32.totalorder %s2545_s29, %s2538_s9 }
  0x76   : > { %p2542_p6 = pneg %p2541_p4  ;;  %p2548_p13 = por %p2547_p2, %p2546_p12 }
  0x78   : > { %p2549_p7 = pnand %p2548_p13, %p2542_p6 }
  0x7a   : > { %2552 = shalt.err (!%p2549_p7)
}
  0x7b   : > { %s2675_s30 = smov 128   ;;  %s2676_s10 = smov 8  }
  0x7c   : > { %1952 = dma.hbm_to_vmem [thread:$0]  (!%p2850_p8), %s2866_s21, 4096, %s2861_s27, %s2868_s25, %s2675_s30, %s2675_s30, %s2676_s10  }
  0x7d   : > { %p3759_p0 = scmp.ne.s32.totalorder %s3751_s22, 0 }
  0x7e   : > { %s223_s16 = sand.u32 (!%p3759_p0), 1, %s2647_s11   ;;  %p3760_p13 = scmp.ne.s32.totalorder (!%p3759_p0), %s3747_s19, 0 }
  0x7f   : > { %221 = sbr.rel (%p3759_p0) target bundleno = 825 (0x339), region = 32  ;;  %s1743_s7 = sshll.u32 (!%p3759_p0), %s223_s16, 8 }
  0x80   : > { %s224_s4 = scalar_lea.sflag (!%p3759_p0), [#allocation7], %s223_s16  ;;  %s2892_s5 = scalar_lea.vmem (!%p3759_p0), [#allocation6], %s1743_s7 }
  0x84   : > { %2618 = dma.done.wait (%p3760_p13), %s224_s4, 4096  }
  0x85   : > { %2620 = vsyncadd (%p3760_p13), %s224_s4, 4294963200  ;;  %p3761_p7 = scmp.ne.s32.totalorder %s3746_s18, 0 }
  0x87   : > { %2622 = dma.done.wait (%p3761_p7), [#allocation10], 10400  }
  0x88   : > { %2624 = vsyncadd (%p3761_p7), [#allocation10], 4294956896  ;;  %s255_s21 = sand.u32 1, %s2635_s8   ;;  %s2904_s22 = sld [smem:[#allocation4 + %s2655_s13]] }
  0x89   : > { %s1746_s27 = sshll.u32 %s255_s21, 8 }
  0x8a   : > { %s2908_s23 = scalar_lea.vmem [#allocation12], %s1746_s27 }
  0x8e   : > { %p1747_p8 = scmp.ne.s32.totalorder %s2904_s22, 0 }
  0x90   : > { %266 = sbr.rel (%p1747_p8) target bundleno = 166 (0xa6), region = 48 }
  0x95   : > { %v2677_v0 = vmov 0.0  }
  0x96   : > { %267 = vst [vmem:[%s2908_s23] sm:$0xff] %v2677_v0  ;;  %268 = vst [vmem:[%s2908_s23 + $0x8] sm:$0xff] %v2677_v0 }
  0x97   : > { %269 = vst [vmem:[%s2908_s23 + $0x10] sm:$0xff] %v2677_v0  ;;  %270 = vst [vmem:[%s2908_s23 + $0x18] sm:$0xff] %v2677_v0 }
  0x98   : > { %271 = vst [vmem:[%s2908_s23 + $0x20] sm:$0xff] %v2677_v0  ;;  %272 = vst [vmem:[%s2908_s23 + $0x28] sm:$0xff] %v2677_v0 }
  0x99   : > { %273 = vst [vmem:[%s2908_s23 + $0x30] sm:$0xff] %v2677_v0  ;;  %274 = vst [vmem:[%s2908_s23 + $0x38] sm:$0xff] %v2677_v0 }
  0x9a   : > { %275 = vst [vmem:[%s2908_s23 + $0x40] sm:$0xff] %v2677_v0  ;;  %276 = vst [vmem:[%s2908_s23 + $0x48] sm:$0xff] %v2677_v0 }
  0x9b   : > { %277 = vst [vmem:[%s2908_s23 + $0x50] sm:$0xff] %v2677_v0  ;;  %278 = vst [vmem:[%s2908_s23 + $0x58] sm:$0xff] %v2677_v0 }
  0x9c   : > { %279 = vst [vmem:[%s2908_s23 + $0x60] sm:$0xff] %v2677_v0  ;;  %280 = vst [vmem:[%s2908_s23 + $0x68] sm:$0xff] %v2677_v0 }
  0x9d   : > { %281 = vst [vmem:[%s2908_s23 + $0x70] sm:$0xff] %v2677_v0  ;;  %282 = vst [vmem:[%s2908_s23 + $0x78] sm:$0xff] %v2677_v0 }
  0x9e   : > { %283 = vst [vmem:[%s2908_s23 + $0x80] sm:$0xff] %v2677_v0  ;;  %284 = vst [vmem:[%s2908_s23 + $0x88] sm:$0xff] %v2677_v0 }
  0x9f   : > { %285 = vst [vmem:[%s2908_s23 + $0x90] sm:$0xff] %v2677_v0  ;;  %286 = vst [vmem:[%s2908_s23 + $0x98] sm:$0xff] %v2677_v0 }
  0xa0   : > { %287 = vst [vmem:[%s2908_s23 + $0xa0] sm:$0xff] %v2677_v0  ;;  %288 = vst [vmem:[%s2908_s23 + $0xa8] sm:$0xff] %v2677_v0 }
  0xa1   : > { %289 = vst [vmem:[%s2908_s23 + $0xb0] sm:$0xff] %v2677_v0  ;;  %290 = vst [vmem:[%s2908_s23 + $0xb8] sm:$0xff] %v2677_v0 }
  0xa2   : > { %291 = vst [vmem:[%s2908_s23 + $0xc0] sm:$0xff] %v2677_v0  ;;  %292 = vst [vmem:[%s2908_s23 + $0xc8] sm:$0xff] %v2677_v0 }
  0xa3   : > { %293 = vst [vmem:[%s2908_s23 + $0xd0] sm:$0xff] %v2677_v0  ;;  %294 = vst [vmem:[%s2908_s23 + $0xd8] sm:$0xff] %v2677_v0 }
  0xa4   : > { %295 = vst [vmem:[%s2908_s23 + $0xe0] sm:$0xff] %v2677_v0  ;;  %296 = vst [vmem:[%s2908_s23 + $0xe8] sm:$0xff] %v2677_v0 }
  0xa5   : > { %297 = vst [vmem:[%s2908_s23 + $0xf0] sm:$0xff] %v2677_v0  ;;  %298 = vst [vmem:[%s2908_s23 + $0xf8] sm:$0xff] %v2677_v0 }
  0xa6 PF: > { %p1748_p1 = scmp.ne.s32.totalorder %s2904_s22, 1 }
  0xa8   : > { %302 = sbr.rel (%p1748_p1) target bundleno = 190 (0xbe), region = 52 }
  0xad   : > { %v303_v1 = vld [vmem:[%s2892_s5] sm:$0xff]  ;;  %v304_v2 = vld [vmem:[%s2892_s5 + $0x8] sm:$0xff]  ;;  %v305_v3 = vld [vmem:[%s2892_s5 + $0x10] sm:$0xff] }
  0xae   : > { %335 = vst [vmem:[%s2908_s23] sm:$0xff] %v303_v1  ;;  %336 = vst [vmem:[%s2908_s23 + $0x8] sm:$0xff] %v304_v2  ;;  %v306_v4 = vld [vmem:[%s2892_s5 + $0x18] sm:$0xff]  ;;  %v307_v5 = vld [vmem:[%s2892_s5 + $0x20] sm:$0xff] }
  0xaf   : > { %337 = vst [vmem:[%s2908_s23 + $0x10] sm:$0xff] %v305_v3  ;;  %v308_v6 = vld [vmem:[%s2892_s5 + $0x28] sm:$0xff]  ;;  %338 = vst [vmem:[%s2908_s23 + $0x18] sm:$0xff] %v306_v4  ;;  %v309_v7 = vld [vmem:[%s2892_s5 + $0x30] sm:$0xff] }
  0xb0   : > { %339 = vst [vmem:[%s2908_s23 + $0x20] sm:$0xff] %v307_v5  ;;  %340 = vst [vmem:[%s2908_s23 + $0x28] sm:$0xff] %v308_v6  ;;  %v310_v8 = vld [vmem:[%s2892_s5 + $0x38] sm:$0xff]  ;;  %v311_v9 = vld [vmem:[%s2892_s5 + $0x40] sm:$0xff] }
  0xb1   : > { %341 = vst [vmem:[%s2908_s23 + $0x30] sm:$0xff] %v309_v7  ;;  %342 = vst [vmem:[%s2908_s23 + $0x38] sm:$0xff] %v310_v8  ;;  %v312_v10 = vld [vmem:[%s2892_s5 + $0x48] sm:$0xff]  ;;  %v313_v11 = vld [vmem:[%s2892_s5 + $0x50] sm:$0xff] }
  0xb2   : > { %343 = vst [vmem:[%s2908_s23 + $0x40] sm:$0xff] %v311_v9  ;;  %v314_v12 = vld [vmem:[%s2892_s5 + $0x58] sm:$0xff]  ;;  %344 = vst [vmem:[%s2908_s23 + $0x48] sm:$0xff] %v312_v10  ;;  %v315_v13 = vld [vmem:[%s2892_s5 + $0x60] sm:$0xff] }
  0xb3   : > { %345 = vst [vmem:[%s2908_s23 + $0x50] sm:$0xff] %v313_v11  ;;  %346 = vst [vmem:[%s2908_s23 + $0x58] sm:$0xff] %v314_v12  ;;  %v316_v14 = vld [vmem:[%s2892_s5 + $0x68] sm:$0xff]  ;;  %v317_v15 = vld [vmem:[%s2892_s5 + $0x70] sm:$0xff] }
  0xb4   : > { %347 = vst [vmem:[%s2908_s23 + $0x60] sm:$0xff] %v315_v13  ;;  %348 = vst [vmem:[%s2908_s23 + $0x68] sm:$0xff] %v316_v14  ;;  %v318_v16 = vld [vmem:[%s2892_s5 + $0x78] sm:$0xff]  ;;  %v319_v17 = vld [vmem:[%s2892_s5 + $0x80] sm:$0xff] }
  0xb5   : > { %349 = vst [vmem:[%s2908_s23 + $0x70] sm:$0xff] %v317_v15  ;;  %v320_v18 = vld [vmem:[%s2892_s5 + $0x88] sm:$0xff]  ;;  %350 = vst [vmem:[%s2908_s23 + $0x78] sm:$0xff] %v318_v16  ;;  %v321_v19 = vld [vmem:[%s2892_s5 + $0x90] sm:$0xff] }
  0xb6   : > { %351 = vst [vmem:[%s2908_s23 + $0x80] sm:$0xff] %v319_v17  ;;  %352 = vst [vmem:[%s2908_s23 + $0x88] sm:$0xff] %v320_v18  ;;  %v322_v20 = vld [vmem:[%s2892_s5 + $0x98] sm:$0xff]  ;;  %v323_v21 = vld [vmem:[%s2892_s5 + $0xa0] sm:$0xff] }
  0xb7   : > { %353 = vst [vmem:[%s2908_s23 + $0x90] sm:$0xff] %v321_v19  ;;  %354 = vst [vmem:[%s2908_s23 + $0x98] sm:$0xff] %v322_v20  ;;  %v324_v22 = vld [vmem:[%s2892_s5 + $0xa8] sm:$0xff]  ;;  %v325_v23 = vld [vmem:[%s2892_s5 + $0xb0] sm:$0xff] }
  0xb8   : > { %355 = vst [vmem:[%s2908_s23 + $0xa0] sm:$0xff] %v323_v21  ;;  %v326_v24 = vld [vmem:[%s2892_s5 + $0xb8] sm:$0xff]  ;;  %356 = vst [vmem:[%s2908_s23 + $0xa8] sm:$0xff] %v324_v22  ;;  %v327_v25 = vld [vmem:[%s2892_s5 + $0xc0] sm:$0xff] }
  0xb9   : > { %357 = vst [vmem:[%s2908_s23 + $0xb0] sm:$0xff] %v325_v23  ;;  %358 = vst [vmem:[%s2908_s23 + $0xb8] sm:$0xff] %v326_v24  ;;  %v328_v26 = vld [vmem:[%s2892_s5 + $0xc8] sm:$0xff]  ;;  %v329_v27 = vld [vmem:[%s2892_s5 + $0xd0] sm:$0xff] }
  0xba   : > { %359 = vst [vmem:[%s2908_s23 + $0xc0] sm:$0xff] %v327_v25  ;;  %360 = vst [vmem:[%s2908_s23 + $0xc8] sm:$0xff] %v328_v26  ;;  %v330_v28 = vld [vmem:[%s2892_s5 + $0xd8] sm:$0xff]  ;;  %v331_v29 = vld [vmem:[%s2892_s5 + $0xe0] sm:$0xff] }
  0xbb   : > { %361 = vst [vmem:[%s2908_s23 + $0xd0] sm:$0xff] %v329_v27  ;;  %v332_v30 = vld [vmem:[%s2892_s5 + $0xe8] sm:$0xff]  ;;  %362 = vst [vmem:[%s2908_s23 + $0xd8] sm:$0xff] %v330_v28  ;;  %v333_v31 = vld [vmem:[%s2892_s5 + $0xf0] sm:$0xff] }
  0xbc   : > { %363 = vst [vmem:[%s2908_s23 + $0xe0] sm:$0xff] %v331_v29  ;;  %364 = vst [vmem:[%s2908_s23 + $0xe8] sm:$0xff] %v332_v30  ;;  %v334_v32 = vld [vmem:[%s2892_s5 + $0xf8] sm:$0xff] }
  0xbd   : > { %365 = vst [vmem:[%s2908_s23 + $0xf0] sm:$0xff] %v333_v31  ;;  %366 = vst [vmem:[%s2908_s23 + $0xf8] sm:$0xff] %v334_v32 }
  0xbe PF: > { %p1749_p11 = scmp.lt.s32.totalorder %s2904_s22, 2 }
  0xbf   : > { %s3010_s18 = sld [smem:[#allocation5 + %s2655_s13]] (!%p1749_p11)  ;;  %s3056_s24 = sadd.s32 (!%p1749_p11), 4294967294, %s2904_s22 }
  0xc0   : > { %370 = sbr.rel (%p1749_p11) target bundleno = 800 (0x320), region = 56  ;;  %p1762_p3 = scmp.ne.s32.totalorder (!%p1749_p11), %s3056_s24, 0 }
  0xc5   : > { %v371_v33 = vld [vmem:[%s2892_s5] sm:$0xff]  ;;  %v372_v34 = vld [vmem:[%s2892_s5 + $0x8] sm:$0xff]  ;;  %s1836_s19 = sshll.u32 %s3010_s18, 6  ;;  %v373_v47 = vld [vmem:[%s2892_s5 + $0x10] sm:$0xff]  ;;  %s423_s1 = scalar_lea.vmem [#allocation11], %s3010_s18 }
  0xc6   : > { %v387_v35 = vld [vmem:[%s2892_s5 + $0x80] sm:$0xff]  ;;  %v425_v36 = vpack.c.bf16 %v372_v34, %v371_v33  ;;  %v388_v37 = vld [vmem:[%s2892_s5 + $0x88] sm:$0xff]  ;;  %s3017_s25 = scalar_lea.vmem [#allocation9], %s1836_s19  ;;  %v374_v48 = vld [vmem:[%s2892_s5 + $0x18] sm:$0xff] }
  0xc7   : > { %v433_v38 = vpack.c.bf16 %v388_v37, %v387_v35  ;;  %v2049_v39 = vld [vmem:[%s3017_s25 + $0x38] sm:$0xff]   ;;  %v2050_v40 = vld [vmem:[%s3017_s25 + $0x30] sm:$0xff]   ;;  %v2051_v41 = vld [vmem:[%s3017_s25 + $0x28] sm:$0xff]   ;;  %v426_v55 = vpack.c.bf16 %v374_v48, %v373_v47 }
  0xc8   : > { %1878 = vmatprep.mubr.bf16.mxu0 %v425_v36  ;;  %1862 = vmatprep.subr.bf16.mxu0 %v2049_v39  ;;  %v2052_v42 = vld [vmem:[%s3017_s25 + $0x20] sm:$0xff]   ;;  %v2053_v43 = vld [vmem:[%s3017_s25 + $0x18] sm:$0xff]   ;;  %v2054_v44 = vld [vmem:[%s3017_s25 + $0x10] sm:$0xff]  }
  0xc9   : > { %1894 = vmatprep.mubr.bf16.mxu1 %v433_v38  ;;  %1910 = vmatprep.subr.bf16.mxu1 %v2049_v39  ;;  %v2055_v45 = vld [vmem:[%s3017_s25 + $0x8] sm:$0xff]   ;;  %v2056_v46 = vld [vmem:[%s3017_s25] sm:$0xff]   ;;  %v389_v49 = vld [vmem:[%s2892_s5 + $0x90] sm:$0xff] }
  0xca   : > { %1863 = vmatpush3.bf16.msra.mxu0 %v2049_v39  ;;  %1918 = vmatpush3.bf16.msra.mxu1 %v2049_v39  ;;  %v390_v50 = vld [vmem:[%s2892_s5 + $0x98] sm:$0xff]  ;;  %v375_v51 = vld [vmem:[%s2892_s5 + $0x20] sm:$0xff]  ;;  %v376_v52 = vld [vmem:[%s2892_s5 + $0x28] sm:$0xff] }
  0xcb   : > { %1864 = vmatprep.subr.bf16.mxu0 %v2050_v40  ;;  %1911 = vmatprep.subr.bf16.mxu1 %v2050_v40  ;;  %v391_v53 = vld [vmem:[%s2892_s5 + $0xa0] sm:$0xff]  ;;  %v392_v54 = vld [vmem:[%s2892_s5 + $0xa8] sm:$0xff]  ;;  %v434_v56 = vpack.c.bf16 %v390_v50, %v389_v49  ;;  %v427_v57 = vpack.c.bf16 %v376_v52, %v375_v51  ;;  %v377_v59 = vld [vmem:[%s2892_s5 + $0x30] sm:$0xff] }
  0xcc   : > { %v435_v58 = vpack.c.bf16 %v392_v54, %v391_v53  ;;  %v378_v60 = vld [vmem:[%s2892_s5 + $0x38] sm:$0xff]  ;;  %v393_v61 = vld [vmem:[%s2892_s5 + $0xb0] sm:$0xff]  ;;  %v379_v63 = vld [vmem:[%s2892_s5 + $0x40] sm:$0xff] }
  0xcd   : > { %v394_v62 = vld [vmem:[%s2892_s5 + $0xb8] sm:$0xff]  ;;  %v380_v0 = vld [vmem:[%s2892_s5 + $0x48] sm:$0xff]  ;;  %v395_v1 = vld [vmem:[%s2892_s5 + $0xc0] sm:$0xff]  ;;  %v428_v3 = vpack.c.bf16 %v378_v60, %v377_v59 }
  0xce   : > { %1865 = vmatpush3.bf16.msra.mxu0 %v2050_v40  ;;  %1919 = vmatpush3.bf16.msra.mxu1 %v2050_v40  ;;  %v396_v2 = vld [vmem:[%s2892_s5 + $0xc8] sm:$0xff]  ;;  %v436_v4 = vpack.c.bf16 %v394_v62, %v393_v61  ;;  %v429_v5 = vpack.c.bf16 %v380_v0, %v379_v63  ;;  %v381_v7 = vld [vmem:[%s2892_s5 + $0x50] sm:$0xff]  ;;  %v382_v8 = vld [vmem:[%s2892_s5 + $0x58] sm:$0xff] }
  0xcf   : > { %1866 = vmatprep.subr.bf16.mxu0 %v2051_v41  ;;  %1912 = vmatprep.subr.bf16.mxu1 %v2051_v41  ;;  %v437_v6 = vpack.c.bf16 %v396_v2, %v395_v1  ;;  %v397_v9 = vld [vmem:[%s2892_s5 + $0xd0] sm:$0xff]  ;;  %v398_v10 = vld [vmem:[%s2892_s5 + $0xd8] sm:$0xff]  ;;  %v383_v11 = vld [vmem:[%s2892_s5 + $0x60] sm:$0xff]  ;;  %v430_v15 = vpack.c.bf16 %v382_v8, %v381_v7 }
  0xd0   : > { %v384_v12 = vld [vmem:[%s2892_s5 + $0x68] sm:$0xff]  ;;  %v399_v13 = vld [vmem:[%s2892_s5 + $0xe0] sm:$0xff]  ;;  %v438_v16 = vpack.c.bf16 %v398_v10, %v397_v9  ;;  %v385_v19 = vld [vmem:[%s2892_s5 + $0x70] sm:$0xff] }
  0xd1   : > { %v400_v14 = vld [vmem:[%s2892_s5 + $0xe8] sm:$0xff]  ;;  %v431_v17 = vpack.c.bf16 %v384_v12, %v383_v11  ;;  %v386_v20 = vld [vmem:[%s2892_s5 + $0x78] sm:$0xff]  ;;  %v401_v21 = vld [vmem:[%s2892_s5 + $0xf0] sm:$0xff] }
  0xd2   : > { %1867 = vmatpush3.bf16.msra.mxu0 %v2051_v41  ;;  %1920 = vmatpush3.bf16.msra.mxu1 %v2051_v41  ;;  %v439_v18 = vpack.c.bf16 %v400_v14, %v399_v13  ;;  %v402_v22 = vld [vmem:[%s2892_s5 + $0xf8] sm:$0xff]  ;;  %v432_v23 = vpack.c.bf16 %v386_v20, %v385_v19  ;;  %v3059_v25 = vld [vmem:[%s423_s1] ss:$0 sm:$0xff] }
  0xd3   : > { %1868 = vmatprep.subr.bf16.mxu0 %v2052_v42  ;;  %1913 = vmatprep.subr.bf16.mxu1 %v2052_v42  ;;  %v440_v24 = vpack.c.bf16 %v402_v22, %v401_v21 }
  0xd6   : > { %1869 = vmatpush3.bf16.msra.mxu0 %v2052_v42  ;;  %1921 = vmatpush3.bf16.msra.mxu1 %v2052_v42 }
  0xd7   : > { %1870 = vmatprep.subr.bf16.mxu0 %v2053_v43  ;;  %1914 = vmatprep.subr.bf16.mxu1 %v2053_v43 }
  0xda   : > { %1871 = vmatpush3.bf16.msra.mxu0 %v2053_v43  ;;  %1922 = vmatpush3.bf16.msra.mxu1 %v2053_v43 }
  0xdb   : > { %1872 = vmatprep.subr.bf16.mxu0 %v2054_v44  ;;  %1915 = vmatprep.subr.bf16.mxu1 %v2054_v44 }
  0xde   : > { %1873 = vmatpush3.bf16.msra.mxu0 %v2054_v44  ;;  %1923 = vmatpush3.bf16.msra.mxu1 %v2054_v44 }
  0xdf   : > { %1874 = vmatprep.subr.bf16.mxu0 %v2055_v45  ;;  %1916 = vmatprep.subr.bf16.mxu1 %v2055_v45 }
  0xe2   : > { %1875 = vmatpush3.bf16.msra.mxu0 %v2055_v45  ;;  %1924 = vmatpush3.bf16.msra.mxu1 %v2055_v45 }
  0xe3   : > { %1876 = vmatprep.subr.bf16.mxu0 %v2056_v46  ;;  %1917 = vmatprep.subr.bf16.mxu1 %v2056_v46 }
  0xe6   : > { %1877 = vmatpush3.bf16.msra.mxu0 %v2056_v46  ;;  %1925 = vmatpush3.bf16.msra.mxu1 %v2056_v46 }
  0xe9   : > { %1879 = vmatmul.mubr.bf16.vlgmr.msra.gmra.mxu0 %v426_v55  ;;  %1895 = vmatmul.mubr.bf16.vlgmr.msra.gmra.mxu1 %v434_v56 }
  0xea   : > { %1882 = vmatprep.mubr.bf16.mxu0 %v427_v57  ;;  %1898 = vmatprep.mubr.bf16.mxu1 %v435_v58 }
  0xf1   : > { %1883 = vmatmul.mubr.bf16.gmra.mxu0 %v428_v3  ;;  %1899 = vmatmul.mubr.bf16.gmra.mxu1 %v436_v4 }
  0xf2   : > { %1886 = vmatprep.mubr.bf16.mxu0 %v429_v5  ;;  %1902 = vmatprep.mubr.bf16.mxu1 %v437_v6 }
  0xf9   : > { %1887 = vmatmul.mubr.bf16.gmra.mxu0 %v430_v15  ;;  %1903 = vmatmul.mubr.bf16.gmra.mxu1 %v438_v16 }
  0xfa   : > { %1890 = vmatprep.mubr.bf16.mxu0 %v431_v17  ;;  %1906 = vmatprep.mubr.bf16.mxu1 %v439_v18 }
 0x101   : > { %1891 = vmatmul.mubr.bf16.gmra.mxu0 %v432_v23  ;;  %1907 = vmatmul.mubr.bf16.gmra.mxu1 %v440_v24 }
 0x1a9   : > { %v1880_v26 = vpop.f32.mrf.mxu0  ;;  %v1896_v27 = vpop.f32.mrf.mxu1 }
 0x1aa   : > { %v3062_v28 = vadd.f32 %v1880_v26, %v3059_v25  ;;  %v3065_v29 = vadd.f32 %v1896_v27, %v3059_v25 }
 0x1ab   : > { %v529_v30 = vpop.f32.mrf.mxu0  ;;  %v593_v31 = vpop.f32.mrf.mxu1 }
 0x1ac   : > { %v3068_v32 = vadd.f32 %v3059_v25, %v529_v30  ;;  %v3071_v33 = vadd.f32 %v3059_v25, %v593_v31 }
 0x1ad   : > { %v1881_v34 = vpop.f32.mrf.mxu0  ;;  %v1897_v35 = vpop.f32.mrf.mxu1 }
 0x1ae   : > { %v3074_v36 = vadd.f32 %v1881_v34, %v3059_v25  ;;  %v3077_v37 = vadd.f32 %v1897_v35, %v3059_v25 }
 0x1af   : > { %v532_v38 = vpop.f32.mrf.mxu0  ;;  %v596_v39 = vpop.f32.mrf.mxu1 }
 0x1b0   : > { %v3080_v40 = vadd.f32 %v3059_v25, %v532_v38  ;;  %v3083_v41 = vadd.f32 %v3059_v25, %v596_v39 }
 0x1b1   : > { %v1884_v42 = vpop.f32.mrf.mxu0  ;;  %v1900_v43 = vpop.f32.mrf.mxu1 }
 0x1b2   : > { %v3086_v44 = vadd.f32 %v1884_v42, %v3059_v25  ;;  %v3089_v45 = vadd.f32 %v1900_v43, %v3059_v25 }
 0x1b3   : > { %v545_v46 = vpop.f32.mrf.mxu0  ;;  %v609_v47 = vpop.f32.mrf.mxu1 }
 0x1b4   : > { %v3092_v48 = vadd.f32 %v3059_v25, %v545_v46  ;;  %v3095_v49 = vadd.f32 %v3059_v25, %v609_v47 }
 0x1b5   : > { %v1885_v50 = vpop.f32.mrf.mxu0  ;;  %v1901_v51 = vpop.f32.mrf.mxu1 }
 0x1b6   : > { %v3098_v52 = vadd.f32 %v1885_v50, %v3059_v25  ;;  %v3101_v53 = vadd.f32 %v1901_v51, %v3059_v25 }
 0x1b7   : > { %v548_v54 = vpop.f32.mrf.mxu0  ;;  %v612_v55 = vpop.f32.mrf.mxu1 }
 0x1b8   : > { %v3104_v56 = vadd.f32 %v3059_v25, %v548_v54  ;;  %v3107_v57 = vadd.f32 %v3059_v25, %v612_v55 }
 0x1b9   : > { %v1888_v58 = vpop.f32.mrf.mxu0  ;;  %v1904_v59 = vpop.f32.mrf.mxu1 }
 0x1ba   : > { %v3110_v60 = vadd.f32 %v1888_v58, %v3059_v25  ;;  %v3113_v61 = vadd.f32 %v1904_v59, %v3059_v25 }
 0x1bb   : > { %v561_v62 = vpop.f32.mrf.mxu0  ;;  %v625_v63 = vpop.f32.mrf.mxu1 }
 0x1bc   : > { %v3116_v0 = vadd.f32 %v3059_v25, %v561_v62  ;;  %v3119_v1 = vadd.f32 %v3059_v25, %v625_v63 }
 0x1bd   : > { %v1889_v2 = vpop.f32.mrf.mxu0  ;;  %v1905_v3 = vpop.f32.mrf.mxu1 }
 0x1be   : > { %v3122_v4 = vadd.f32 %v1889_v2, %v3059_v25  ;;  %v3125_v5 = vadd.f32 %v1905_v3, %v3059_v25 }
 0x1bf   : > { %v564_v6 = vpop.f32.mrf.mxu0  ;;  %v628_v7 = vpop.f32.mrf.mxu1 }
 0x1c0   : > { %v3128_v8 = vadd.f32 %v3059_v25, %v564_v6  ;;  %v3131_v9 = vadd.f32 %v3059_v25, %v628_v7 }
 0x1c1   : > { %v1892_v10 = vpop.f32.mrf.mxu0  ;;  %v1908_v11 = vpop.f32.mrf.mxu1 }
 0x1c2   : > { %v3134_v12 = vadd.f32 %v1892_v10, %v3059_v25  ;;  %v3137_v13 = vadd.f32 %v1908_v11, %v3059_v25 }
 0x1c3   : > { %v577_v14 = vpop.f32.mrf.mxu0  ;;  %v641_v15 = vpop.f32.mrf.mxu1 }
 0x1c4   : > { %v3140_v16 = vadd.f32 %v3059_v25, %v577_v14  ;;  %v3143_v17 = vadd.f32 %v3059_v25, %v641_v15  ;;  %660 = sbr.rel (%p1762_p3) target bundleno = 537 (0x219), region = 60 }
 0x1c5   : > { %v1893_v18 = vpop.f32.mrf.mxu0  ;;  %v1909_v19 = vpop.f32.mrf.mxu1 }
 0x1c6   : > { %v3146_v20 = vadd.f32 %v1893_v18, %v3059_v25  ;;  %v3149_v21 = vadd.f32 %v1909_v19, %v3059_v25 }
 0x1c7   : > { %v580_v22 = vpop.f32.mrf.mxu0  ;;  %v644_v23 = vpop.f32.mrf.mxu1 }
 0x1c8   : > { %v3152_v24 = vadd.f32 %v3059_v25, %v580_v22  ;;  %v3155_v26 = vadd.f32 %v3059_v25, %v644_v23 }
 0x1c9   : > { %v1763_v27 = vmul.f32 -1.442695, %v3068_v32  ;;  %v1764_v30 = vmul.f32 -1.442695, %v3080_v40  ;;  %v1765_v31 = vmul.f32 -1.442695, %v3062_v28 }
 0x1ca   : > { %v1766_v34 = vmul.f32 -1.442695, %v3074_v36  ;;  %v1767_v35 = vmul.f32 -1.442695, %v3092_v48  ;;  %v1768_v38 = vmul.f32 -1.442695, %v3104_v56 }
 0x1cb   : > { %2057 = vpow2.f32 %v1763_v27  ;;  %v1769_v25 = vmul.f32 -1.442695, %v3086_v44  ;;  %v1770_v39 = vmul.f32 -1.442695, %v3098_v52  ;;  %v1771_v42 = vmul.f32 -1.442695, %v3116_v0 }
 0x1cc   : > { %2059 = vpow2.f32 %v1764_v30  ;;  %v1772_v43 = vmul.f32 -1.442695, %v3128_v8  ;;  %v1773_v46 = vmul.f32 -1.442695, %v3110_v60  ;;  %v1774_v47 = vmul.f32 -1.442695, %v3122_v4 }
 0x1cd   : > { %2061 = vpow2.f32 %v1765_v31  ;;  %v1775_v50 = vmul.f32 -1.442695, %v3140_v16  ;;  %v1776_v51 = vmul.f32 -1.442695, %v3152_v24  ;;  %v1777_v54 = vmul.f32 -1.442695, %v3134_v12 }
 0x1ce   : > { %2063 = vpow2.f32 %v1766_v34  ;;  %v1778_v55 = vmul.f32 -1.442695, %v3146_v20 }
 0x1cf   : > { %2065 = vpow2.f32 %v1767_v35 }
 0x1d0   : > { %2067 = vpow2.f32 %v1768_v38 }
 0x1d1   : > { %2069 = vpow2.f32 %v1769_v25 }
 0x1d2   : > { %2071 = vpow2.f32 %v1770_v39 }
 0x1d3   : > { %2073 = vpow2.f32 %v1771_v42 }
 0x1d4   : > { %2075 = vpow2.f32 %v1772_v43 }
 0x1d5   : > { %2077 = vpow2.f32 %v1773_v46 }
 0x1d6   : > { %2079 = vpow2.f32 %v1774_v47 }
 0x1d7   : > { %2081 = vpow2.f32 %v1775_v50 }
 0x1d8   : > { %v2058_v58 = vpop.eup %2057  ;;  %2083 = vpow2.f32 %v1776_v51 }
 0x1d9   : > { %v2060_v59 = vpop.eup %2059  ;;  %v757_v62 = vadd.f32 1.0, %v2058_v58  ;;  %2085 = vpow2.f32 %v1777_v54 }
 0x1da   : > { %v2062_v63 = vpop.eup %2061  ;;  %v758_v2 = vadd.f32 1.0, %v2060_v59  ;;  %2087 = vpow2.f32 %v1778_v55  ;;  %v1779_v55 = vmul.f32 -1.442695, %v3071_v33 }
 0x1db   : > { %v2064_v3 = vpop.eup %2063  ;;  %2089 = vrcp.f32 %v757_v62  ;;  %v759_v6 = vadd.f32 1.0, %v2062_v63  ;;  %v1780_v62 = vmul.f32 -1.442695, %v3083_v41 }
 0x1dc   : > { %v2066_v7 = vpop.eup %2065  ;;  %2091 = vrcp.f32 %v758_v2  ;;  %v760_v10 = vadd.f32 1.0, %v2064_v3  ;;  %v1781_v2 = vmul.f32 -1.442695, %v3065_v29 }
 0x1dd   : > { %v2068_v11 = vpop.eup %2067  ;;  %2093 = vrcp.f32 %v759_v6  ;;  %v761_v14 = vadd.f32 1.0, %v2066_v7  ;;  %v1782_v6 = vmul.f32 -1.442695, %v3077_v37 }
 0x1de   : > { %v2070_v15 = vpop.eup %2069  ;;  %2095 = vrcp.f32 %v760_v10  ;;  %v762_v18 = vadd.f32 1.0, %v2068_v11  ;;  %v1783_v10 = vmul.f32 -1.442695, %v3095_v49 }
 0x1df   : > { %v2072_v19 = vpop.eup %2071  ;;  %2097 = vrcp.f32 %v761_v14  ;;  %v763_v22 = vadd.f32 1.0, %v2070_v15  ;;  %v1784_v14 = vmul.f32 -1.442695, %v3107_v57 }
 0x1e0   : > { %v2074_v23 = vpop.eup %2073  ;;  %2099 = vrcp.f32 %v762_v18  ;;  %v764_v27 = vadd.f32 1.0, %v2072_v19  ;;  %v1785_v18 = vmul.f32 -1.442695, %v3089_v45 }
 0x1e1   : > { %v2076_v30 = vpop.eup %2075  ;;  %2101 = vrcp.f32 %v763_v22  ;;  %v765_v31 = vadd.f32 1.0, %v2074_v23  ;;  %v1786_v22 = vmul.f32 -1.442695, %v3101_v53 }
 0x1e2   : > { %v2078_v34 = vpop.eup %2077  ;;  %2103 = vrcp.f32 %v764_v27  ;;  %v766_v35 = vadd.f32 1.0, %v2076_v30  ;;  %v1787_v27 = vmul.f32 -1.442695, %v3119_v1 }
 0x1e3   : > { %v2080_v38 = vpop.eup %2079  ;;  %2105 = vrcp.f32 %v765_v31  ;;  %v767_v25 = vadd.f32 1.0, %v2078_v34  ;;  %v1788_v31 = vmul.f32 -1.442695, %v3131_v9 }
 0x1e4   : > { %v2082_v39 = vpop.eup %2081  ;;  %2107 = vrcp.f32 %v766_v35  ;;  %v768_v42 = vadd.f32 1.0, %v2080_v38  ;;  %v1789_v35 = vmul.f32 -1.442695, %v3113_v61 }
 0x1e5   : > { %v2084_v43 = vpop.eup %2083  ;;  %2109 = vrcp.f32 %v767_v25  ;;  %v769_v46 = vadd.f32 1.0, %v2082_v39  ;;  %v1790_v25 = vmul.f32 -1.442695, %v3125_v5 }
 0x1e6   : > { %v2086_v47 = vpop.eup %2085  ;;  %2111 = vrcp.f32 %v768_v42  ;;  %v770_v50 = vadd.f32 1.0, %v2084_v43  ;;  %v1791_v42 = vmul.f32 -1.442695, %v3143_v17 }
 0x1e7   : > { %v2088_v51 = vpop.eup %2087  ;;  %2113 = vrcp.f32 %v769_v46  ;;  %v771_v54 = vadd.f32 1.0, %v2086_v47  ;;  %v1792_v46 = vmul.f32 -1.442695, %v3155_v26 }
 0x1e8   : > { %v2090_v58 = vpop.eup %2089  ;;  %2115 = vrcp.f32 %v770_v50  ;;  %v772_v59 = vadd.f32 1.0, %v2088_v51  ;;  %v1793_v50 = vmul.f32 -1.442695, %v3137_v13 }
 0x1e9   : > { %v2092_v63 = vpop.eup %2091  ;;  %853 = vst [vmem:[%s2908_s23] sm:$0xff] %v2090_v58  ;;  %2117 = vrcp.f32 %v771_v54  ;;  %v1794_v54 = vmul.f32 -1.442695, %v3149_v21 }
 0x1ea   : > { %v2094_v3 = vpop.eup %2093  ;;  %854 = vst [vmem:[%s2908_s23 + $0x8] sm:$0xff] %v2092_v63  ;;  %2119 = vrcp.f32 %v772_v59 }
 0x1eb   : > { %v2096_v7 = vpop.eup %2095  ;;  %855 = vst [vmem:[%s2908_s23 + $0x10] sm:$0xff] %v2094_v3  ;;  %2121 = vpow2.f32 %v1779_v55 }
 0x1ec   : > { %v2098_v11 = vpop.eup %2097  ;;  %856 = vst [vmem:[%s2908_s23 + $0x18] sm:$0xff] %v2096_v7  ;;  %2123 = vpow2.f32 %v1780_v62 }
 0x1ed   : > { %v2100_v15 = vpop.eup %2099  ;;  %857 = vst [vmem:[%s2908_s23 + $0x20] sm:$0xff] %v2098_v11  ;;  %2125 = vpow2.f32 %v1781_v2 }
 0x1ee   : > { %v2102_v19 = vpop.eup %2101  ;;  %858 = vst [vmem:[%s2908_s23 + $0x28] sm:$0xff] %v2100_v15  ;;  %2127 = vpow2.f32 %v1782_v6 }
 0x1ef   : > { %v2104_v23 = vpop.eup %2103  ;;  %859 = vst [vmem:[%s2908_s23 + $0x30] sm:$0xff] %v2102_v19  ;;  %2129 = vpow2.f32 %v1783_v10 }
 0x1f0   : > { %v2106_v30 = vpop.eup %2105  ;;  %860 = vst [vmem:[%s2908_s23 + $0x38] sm:$0xff] %v2104_v23  ;;  %2131 = vpow2.f32 %v1784_v14 }
 0x1f1   : > { %v2108_v34 = vpop.eup %2107  ;;  %861 = vst [vmem:[%s2908_s23 + $0x40] sm:$0xff] %v2106_v30  ;;  %2133 = vpow2.f32 %v1785_v18 }
 0x1f2   : > { %v2110_v38 = vpop.eup %2109  ;;  %862 = vst [vmem:[%s2908_s23 + $0x48] sm:$0xff] %v2108_v34  ;;  %2135 = vpow2.f32 %v1786_v22 }
 0x1f3   : > { %v2112_v39 = vpop.eup %2111  ;;  %863 = vst [vmem:[%s2908_s23 + $0x50] sm:$0xff] %v2110_v38  ;;  %2137 = vpow2.f32 %v1787_v27 }
 0x1f4   : > { %v2114_v43 = vpop.eup %2113  ;;  %864 = vst [vmem:[%s2908_s23 + $0x58] sm:$0xff] %v2112_v39  ;;  %2139 = vpow2.f32 %v1788_v31 }
 0x1f5   : > { %v2116_v47 = vpop.eup %2115  ;;  %865 = vst [vmem:[%s2908_s23 + $0x60] sm:$0xff] %v2114_v43  ;;  %2141 = vpow2.f32 %v1789_v35 }
 0x1f6   : > { %v2118_v51 = vpop.eup %2117  ;;  %866 = vst [vmem:[%s2908_s23 + $0x68] sm:$0xff] %v2116_v47  ;;  %2143 = vpow2.f32 %v1790_v25 }
 0x1f7   : > { %v2120_v55 = vpop.eup %2119  ;;  %867 = vst [vmem:[%s2908_s23 + $0x70] sm:$0xff] %v2118_v51  ;;  %2145 = vpow2.f32 %v1791_v42 }
 0x1f8   : > { %v2122_v58 = vpop.eup %2121  ;;  %868 = vst [vmem:[%s2908_s23 + $0x78] sm:$0xff] %v2120_v55  ;;  %2147 = vpow2.f32 %v1792_v46 }
 0x1f9   : > { %v2124_v59 = vpop.eup %2123  ;;  %v773_v62 = vadd.f32 1.0, %v2122_v58  ;;  %2149 = vpow2.f32 %v1793_v50 }
 0x1fa   : > { %v2126_v63 = vpop.eup %2125  ;;  %v774_v2 = vadd.f32 1.0, %v2124_v59  ;;  %2151 = vpow2.f32 %v1794_v54 }
 0x1fb   : > { %v2128_v3 = vpop.eup %2127  ;;  %2153 = vrcp.f32 %v773_v62  ;;  %v775_v6 = vadd.f32 1.0, %v2126_v63 }
 0x1fc   : > { %v2130_v7 = vpop.eup %2129  ;;  %2155 = vrcp.f32 %v774_v2  ;;  %v776_v10 = vadd.f32 1.0, %v2128_v3 }
 0x1fd   : > { %v2132_v11 = vpop.eup %2131  ;;  %2157 = vrcp.f32 %v775_v6  ;;  %v777_v14 = vadd.f32 1.0, %v2130_v7 }
 0x1fe   : > { %v2134_v15 = vpop.eup %2133  ;;  %2159 = vrcp.f32 %v776_v10  ;;  %v778_v18 = vadd.f32 1.0, %v2132_v11 }
 0x1ff   : > { %v2136_v19 = vpop.eup %2135  ;;  %2161 = vrcp.f32 %v777_v14  ;;  %v779_v22 = vadd.f32 1.0, %v2134_v15 }
 0x200   : > { %v2138_v23 = vpop.eup %2137  ;;  %2163 = vrcp.f32 %v778_v18  ;;  %v780_v27 = vadd.f32 1.0, %v2136_v19 }
 0x201   : > { %v2140_v30 = vpop.eup %2139  ;;  %2165 = vrcp.f32 %v779_v22  ;;  %v781_v31 = vadd.f32 1.0, %v2138_v23 }
 0x202   : > { %v2142_v34 = vpop.eup %2141  ;;  %2167 = vrcp.f32 %v780_v27  ;;  %v782_v35 = vadd.f32 1.0, %v2140_v30 }
 0x203   : > { %v2144_v38 = vpop.eup %2143  ;;  %2169 = vrcp.f32 %v781_v31  ;;  %v783_v25 = vadd.f32 1.0, %v2142_v34 }
 0x204   : > { %v2146_v39 = vpop.eup %2145  ;;  %2171 = vrcp.f32 %v782_v35  ;;  %v784_v42 = vadd.f32 1.0, %v2144_v38 }
 0x205   : > { %v2148_v43 = vpop.eup %2147  ;;  %2173 = vrcp.f32 %v783_v25  ;;  %v785_v46 = vadd.f32 1.0, %v2146_v39 }
 0x206   : > { %v2150_v47 = vpop.eup %2149  ;;  %2175 = vrcp.f32 %v784_v42  ;;  %v786_v50 = vadd.f32 1.0, %v2148_v43 }
 0x207   : > { %v2152_v51 = vpop.eup %2151  ;;  %2177 = vrcp.f32 %v785_v46  ;;  %v787_v54 = vadd.f32 1.0, %v2150_v47 }
 0x208   : > { %v2154_v55 = vpop.eup %2153  ;;  %2179 = vrcp.f32 %v786_v50  ;;  %v788_v58 = vadd.f32 1.0, %v2152_v51 }
 0x209   : > { %v2156_v59 = vpop.eup %2155  ;;  %869 = vst [vmem:[%s2908_s23 + $0x80] sm:$0xff] %v2154_v55  ;;  %2181 = vrcp.f32 %v787_v54 }
 0x20a   : > { %v2158_v62 = vpop.eup %2157  ;;  %870 = vst [vmem:[%s2908_s23 + $0x88] sm:$0xff] %v2156_v59  ;;  %2183 = vrcp.f32 %v788_v58 }
 0x20b   : > { %v2160_v63 = vpop.eup %2159  ;;  %871 = vst [vmem:[%s2908_s23 + $0x90] sm:$0xff] %v2158_v62 }
 0x20c   : > { %v2162_v2 = vpop.eup %2161  ;;  %872 = vst [vmem:[%s2908_s23 + $0x98] sm:$0xff] %v2160_v63 }
 0x20d   : > { %v2164_v3 = vpop.eup %2163  ;;  %873 = vst [vmem:[%s2908_s23 + $0xa0] sm:$0xff] %v2162_v2 }
 0x20e   : > { %v2166_v6 = vpop.eup %2165  ;;  %874 = vst [vmem:[%s2908_s23 + $0xa8] sm:$0xff] %v2164_v3 }
 0x20f   : > { %v2168_v7 = vpop.eup %2167  ;;  %875 = vst [vmem:[%s2908_s23 + $0xb0] sm:$0xff] %v2166_v6 }
 0x210   : > { %v2170_v10 = vpop.eup %2169  ;;  %876 = vst [vmem:[%s2908_s23 + $0xb8] sm:$0xff] %v2168_v7 }
 0x211   : > { %v2172_v11 = vpop.eup %2171  ;;  %877 = vst [vmem:[%s2908_s23 + $0xc0] sm:$0xff] %v2170_v10 }
 0x212   : > { %v2174_v14 = vpop.eup %2173  ;;  %878 = vst [vmem:[%s2908_s23 + $0xc8] sm:$0xff] %v2172_v11 }
 0x213   : > { %v2176_v15 = vpop.eup %2175  ;;  %879 = vst [vmem:[%s2908_s23 + $0xd0] sm:$0xff] %v2174_v14 }
 0x214   : > { %v2178_v18 = vpop.eup %2177  ;;  %880 = vst [vmem:[%s2908_s23 + $0xd8] sm:$0xff] %v2176_v15 }
 0x215   : > { %v2180_v19 = vpop.eup %2179  ;;  %881 = vst [vmem:[%s2908_s23 + $0xe0] sm:$0xff] %v2178_v18 }
 0x216   : > { %v2182_v22 = vpop.eup %2181  ;;  %882 = vst [vmem:[%s2908_s23 + $0xe8] sm:$0xff] %v2180_v19 }
 0x217   : > { %v2184_v23 = vpop.eup %2183  ;;  %883 = vst [vmem:[%s2908_s23 + $0xf0] sm:$0xff] %v2182_v22 }
 0x218   : > { %884 = vst [vmem:[%s2908_s23 + $0xf8] sm:$0xff] %v2184_v23 }
 0x219 PF: > { %p1795_p5 = scmp.ne.s32.totalorder %s3056_s24, 1 }
 0x21b   : > { %888 = sbr.rel (%p1795_p5) target bundleno = 590 (0x24e), region = 64 }
 0x220   : > { %2185 = vtanh.f32 %v3068_v32 }
 0x221   : > { %2187 = vtanh.f32 %v3080_v40 }
 0x222   : > { %2189 = vtanh.f32 %v3062_v28 }
 0x223   : > { %2191 = vtanh.f32 %v3074_v36 }
 0x224   : > { %2193 = vtanh.f32 %v3092_v48 }
 0x225   : > { %2195 = vtanh.f32 %v3104_v56 }
 0x226   : > { %2197 = vtanh.f32 %v3086_v44 }
 0x227   : > { %2199 = vtanh.f32 %v3098_v52 }
 0x228   : > { %2201 = vtanh.f32 %v3116_v0 }
 0x229   : > { %2203 = vtanh.f32 %v3128_v8 }
 0x22a   : > { %2205 = vtanh.f32 %v3110_v60 }
 0x22b   : > { %2207 = vtanh.f32 %v3122_v4 }
 0x22c   : > { %2209 = vtanh.f32 %v3140_v16 }
 0x22d   : > { %v2186_v27 = vpop.eup %2185  ;;  %2211 = vtanh.f32 %v3152_v24 }
 0x22e   : > { %v2188_v30 = vpop.eup %2187  ;;  %921 = vst [vmem:[%s2908_s23] sm:$0xff] %v2186_v27  ;;  %2213 = vtanh.f32 %v3134_v12 }
 0x22f   : > { %v2190_v31 = vpop.eup %2189  ;;  %922 = vst [vmem:[%s2908_s23 + $0x8] sm:$0xff] %v2188_v30  ;;  %2215 = vtanh.f32 %v3146_v20 }
 0x230   : > { %v2192_v34 = vpop.eup %2191  ;;  %923 = vst [vmem:[%s2908_s23 + $0x10] sm:$0xff] %v2190_v31  ;;  %2217 = vtanh.f32 %v3071_v33 }
 0x231   : > { %v2194_v35 = vpop.eup %2193  ;;  %924 = vst [vmem:[%s2908_s23 + $0x18] sm:$0xff] %v2192_v34  ;;  %2219 = vtanh.f32 %v3083_v41 }
 0x232   : > { %v2196_v38 = vpop.eup %2195  ;;  %925 = vst [vmem:[%s2908_s23 + $0x20] sm:$0xff] %v2194_v35  ;;  %2221 = vtanh.f32 %v3065_v29 }
 0x233   : > { %v2198_v25 = vpop.eup %2197  ;;  %926 = vst [vmem:[%s2908_s23 + $0x28] sm:$0xff] %v2196_v38  ;;  %2223 = vtanh.f32 %v3077_v37 }
 0x234   : > { %v2200_v39 = vpop.eup %2199  ;;  %927 = vst [vmem:[%s2908_s23 + $0x30] sm:$0xff] %v2198_v25  ;;  %2225 = vtanh.f32 %v3095_v49 }
 0x235   : > { %v2202_v42 = vpop.eup %2201  ;;  %928 = vst [vmem:[%s2908_s23 + $0x38] sm:$0xff] %v2200_v39  ;;  %2227 = vtanh.f32 %v3107_v57 }
 0x236   : > { %v2204_v43 = vpop.eup %2203  ;;  %929 = vst [vmem:[%s2908_s23 + $0x40] sm:$0xff] %v2202_v42  ;;  %2229 = vtanh.f32 %v3089_v45 }
 0x237   : > { %v2206_v46 = vpop.eup %2205  ;;  %930 = vst [vmem:[%s2908_s23 + $0x48] sm:$0xff] %v2204_v43  ;;  %2231 = vtanh.f32 %v3101_v53 }
 0x238   : > { %v2208_v47 = vpop.eup %2207  ;;  %931 = vst [vmem:[%s2908_s23 + $0x50] sm:$0xff] %v2206_v46  ;;  %2233 = vtanh.f32 %v3119_v1 }
 0x239   : > { %v2210_v50 = vpop.eup %2209  ;;  %932 = vst [vmem:[%s2908_s23 + $0x58] sm:$0xff] %v2208_v47  ;;  %2235 = vtanh.f32 %v3131_v9 }
 0x23a   : > { %v2212_v51 = vpop.eup %2211  ;;  %933 = vst [vmem:[%s2908_s23 + $0x60] sm:$0xff] %v2210_v50  ;;  %2237 = vtanh.f32 %v3113_v61 }
 0x23b   : > { %v2214_v54 = vpop.eup %2213  ;;  %934 = vst [vmem:[%s2908_s23 + $0x68] sm:$0xff] %v2212_v51  ;;  %2239 = vtanh.f32 %v3125_v5 }
 0x23c   : > { %v2216_v55 = vpop.eup %2215  ;;  %935 = vst [vmem:[%s2908_s23 + $0x70] sm:$0xff] %v2214_v54  ;;  %2241 = vtanh.f32 %v3143_v17 }
 0x23d   : > { %v2218_v58 = vpop.eup %2217  ;;  %936 = vst [vmem:[%s2908_s23 + $0x78] sm:$0xff] %v2216_v55  ;;  %2243 = vtanh.f32 %v3155_v26 }
 0x23e   : > { %v2220_v59 = vpop.eup %2219  ;;  %937 = vst [vmem:[%s2908_s23 + $0x80] sm:$0xff] %v2218_v58  ;;  %2245 = vtanh.f32 %v3137_v13 }
 0x23f   : > { %v2222_v62 = vpop.eup %2221  ;;  %938 = vst [vmem:[%s2908_s23 + $0x88] sm:$0xff] %v2220_v59  ;;  %2247 = vtanh.f32 %v3149_v21 }
 0x240   : > { %v2224_v63 = vpop.eup %2223  ;;  %939 = vst [vmem:[%s2908_s23 + $0x90] sm:$0xff] %v2222_v62 }
 0x241   : > { %v2226_v2 = vpop.eup %2225  ;;  %940 = vst [vmem:[%s2908_s23 + $0x98] sm:$0xff] %v2224_v63 }
 0x242   : > { %v2228_v3 = vpop.eup %2227  ;;  %941 = vst [vmem:[%s2908_s23 + $0xa0] sm:$0xff] %v2226_v2 }
 0x243   : > { %v2230_v6 = vpop.eup %2229  ;;  %942 = vst [vmem:[%s2908_s23 + $0xa8] sm:$0xff] %v2228_v3 }
 0x244   : > { %v2232_v7 = vpop.eup %2231  ;;  %943 = vst [vmem:[%s2908_s23 + $0xb0] sm:$0xff] %v2230_v6 }
 0x245   : > { %v2234_v10 = vpop.eup %2233  ;;  %944 = vst [vmem:[%s2908_s23 + $0xb8] sm:$0xff] %v2232_v7 }
 0x246   : > { %v2236_v11 = vpop.eup %2235  ;;  %945 = vst [vmem:[%s2908_s23 + $0xc0] sm:$0xff] %v2234_v10 }
 0x247   : > { %v2238_v14 = vpop.eup %2237  ;;  %946 = vst [vmem:[%s2908_s23 + $0xc8] sm:$0xff] %v2236_v11 }
 0x248   : > { %v2240_v15 = vpop.eup %2239  ;;  %947 = vst [vmem:[%s2908_s23 + $0xd0] sm:$0xff] %v2238_v14 }
 0x249   : > { %v2242_v18 = vpop.eup %2241  ;;  %948 = vst [vmem:[%s2908_s23 + $0xd8] sm:$0xff] %v2240_v15 }
 0x24a   : > { %v2244_v19 = vpop.eup %2243  ;;  %949 = vst [vmem:[%s2908_s23 + $0xe0] sm:$0xff] %v2242_v18 }
 0x24b   : > { %v2246_v22 = vpop.eup %2245  ;;  %950 = vst [vmem:[%s2908_s23 + $0xe8] sm:$0xff] %v2244_v19 }
 0x24c   : > { %v2248_v23 = vpop.eup %2247  ;;  %951 = vst [vmem:[%s2908_s23 + $0xf0] sm:$0xff] %v2246_v22 }
 0x24d   : > { %952 = vst [vmem:[%s2908_s23 + $0xf8] sm:$0xff] %v2248_v23 }
 0x24e PF: > { %p1796_p10 = scmp.ne.s32.totalorder %s3056_s24, 2 }
 0x250   : > { %956 = sbr.rel (%p1796_p10) target bundleno = 615 (0x267), region = 68 }
 0x255   : > { %v957_v27 = vmax.f32 %v3068_v32, 0.0  ;;  %v958_v30 = vmax.f32 %v3080_v40, 0.0  ;;  %v959_v31 = vmax.f32 %v3062_v28, 0.0  ;;  %v960_v34 = vmax.f32 %v3074_v36, 0.0 }
 0x256   : > { %v961_v35 = vmax.f32 %v3092_v48, 0.0  ;;  %v962_v38 = vmax.f32 %v3104_v56, 0.0  ;;  %v963_v25 = vmax.f32 %v3086_v44, 0.0  ;;  %v964_v39 = vmax.f32 %v3098_v52, 0.0 }
 0x257   : > { %989 = vst [vmem:[%s2908_s23] sm:$0xff] %v957_v27  ;;  %990 = vst [vmem:[%s2908_s23 + $0x8] sm:$0xff] %v958_v30  ;;  %v965_v42 = vmax.f32 %v3116_v0, 0.0  ;;  %v966_v43 = vmax.f32 %v3128_v8, 0.0  ;;  %v967_v46 = vmax.f32 %v3110_v60, 0.0  ;;  %v968_v47 = vmax.f32 %v3122_v4, 0.0 }
 0x258   : > { %991 = vst [vmem:[%s2908_s23 + $0x10] sm:$0xff] %v959_v31  ;;  %992 = vst [vmem:[%s2908_s23 + $0x18] sm:$0xff] %v960_v34  ;;  %v969_v50 = vmax.f32 %v3140_v16, 0.0  ;;  %v970_v51 = vmax.f32 %v3152_v24, 0.0  ;;  %v971_v54 = vmax.f32 %v3134_v12, 0.0  ;;  %v972_v55 = vmax.f32 %v3146_v20, 0.0 }
 0x259   : > { %993 = vst [vmem:[%s2908_s23 + $0x20] sm:$0xff] %v961_v35  ;;  %994 = vst [vmem:[%s2908_s23 + $0x28] sm:$0xff] %v962_v38  ;;  %v973_v58 = vmax.f32 %v3071_v33, 0.0  ;;  %v974_v59 = vmax.f32 %v3083_v41, 0.0  ;;  %v975_v62 = vmax.f32 %v3065_v29, 0.0  ;;  %v976_v63 = vmax.f32 %v3077_v37, 0.0 }
 0x25a   : > { %995 = vst [vmem:[%s2908_s23 + $0x30] sm:$0xff] %v963_v25  ;;  %996 = vst [vmem:[%s2908_s23 + $0x38] sm:$0xff] %v964_v39  ;;  %v977_v2 = vmax.f32 %v3095_v49, 0.0  ;;  %v978_v3 = vmax.f32 %v3107_v57, 0.0  ;;  %v979_v6 = vmax.f32 %v3089_v45, 0.0  ;;  %v980_v7 = vmax.f32 %v3101_v53, 0.0 }
 0x25b   : > { %997 = vst [vmem:[%s2908_s23 + $0x40] sm:$0xff] %v965_v42  ;;  %998 = vst [vmem:[%s2908_s23 + $0x48] sm:$0xff] %v966_v43  ;;  %v981_v10 = vmax.f32 %v3119_v1, 0.0  ;;  %v982_v11 = vmax.f32 %v3131_v9, 0.0  ;;  %v983_v14 = vmax.f32 %v3113_v61, 0.0  ;;  %v984_v15 = vmax.f32 %v3125_v5, 0.0 }
 0x25c   : > { %999 = vst [vmem:[%s2908_s23 + $0x50] sm:$0xff] %v967_v46  ;;  %1000 = vst [vmem:[%s2908_s23 + $0x58] sm:$0xff] %v968_v47  ;;  %v985_v18 = vmax.f32 %v3143_v17, 0.0  ;;  %v986_v19 = vmax.f32 %v3155_v26, 0.0  ;;  %v987_v22 = vmax.f32 %v3137_v13, 0.0  ;;  %v988_v23 = vmax.f32 %v3149_v21, 0.0 }
 0x25d   : > { %1001 = vst [vmem:[%s2908_s23 + $0x60] sm:$0xff] %v969_v50  ;;  %1002 = vst [vmem:[%s2908_s23 + $0x68] sm:$0xff] %v970_v51 }
 0x25e   : > { %1003 = vst [vmem:[%s2908_s23 + $0x70] sm:$0xff] %v971_v54  ;;  %1004 = vst [vmem:[%s2908_s23 + $0x78] sm:$0xff] %v972_v55 }
 0x25f   : > { %1005 = vst [vmem:[%s2908_s23 + $0x80] sm:$0xff] %v973_v58  ;;  %1006 = vst [vmem:[%s2908_s23 + $0x88] sm:$0xff] %v974_v59 }
 0x260   : > { %1007 = vst [vmem:[%s2908_s23 + $0x90] sm:$0xff] %v975_v62  ;;  %1008 = vst [vmem:[%s2908_s23 + $0x98] sm:$0xff] %v976_v63 }
 0x261   : > { %1009 = vst [vmem:[%s2908_s23 + $0xa0] sm:$0xff] %v977_v2  ;;  %1010 = vst [vmem:[%s2908_s23 + $0xa8] sm:$0xff] %v978_v3 }
 0x262   : > { %1011 = vst [vmem:[%s2908_s23 + $0xb0] sm:$0xff] %v979_v6  ;;  %1012 = vst [vmem:[%s2908_s23 + $0xb8] sm:$0xff] %v980_v7 }
 0x263   : > { %1013 = vst [vmem:[%s2908_s23 + $0xc0] sm:$0xff] %v981_v10  ;;  %1014 = vst [vmem:[%s2908_s23 + $0xc8] sm:$0xff] %v982_v11 }
 0x264   : > { %1015 = vst [vmem:[%s2908_s23 + $0xd0] sm:$0xff] %v983_v14  ;;  %1016 = vst [vmem:[%s2908_s23 + $0xd8] sm:$0xff] %v984_v15 }
 0x265   : > { %1017 = vst [vmem:[%s2908_s23 + $0xe0] sm:$0xff] %v985_v18  ;;  %1018 = vst [vmem:[%s2908_s23 + $0xe8] sm:$0xff] %v986_v19 }
 0x266   : > { %1019 = vst [vmem:[%s2908_s23 + $0xf0] sm:$0xff] %v987_v22  ;;  %1020 = vst [vmem:[%s2908_s23 + $0xf8] sm:$0xff] %v988_v23 }
 0x267 PF: > { %p1797_p9 = scmp.ne.s32.totalorder %s3056_s24, 3 }
 0x269   : > { %1024 = sbr.rel (%p1797_p9) target bundleno = 711 (0x2c7), region = 72 }
 0x26e   : > { %v1057_v27 = vmul.f32 0.044715, %v3068_v32  ;;  %v1058_v30 = vmul.f32 0.044715, %v3080_v40  ;;  %v1059_v31 = vmul.f32 0.044715, %v3062_v28 }
 0x26f   : > { %v1060_v34 = vmul.f32 0.044715, %v3074_v36  ;;  %v1061_v25 = vmul.f32 0.044715, %v3092_v48  ;;  %v1062_v43 = vmul.f32 0.044715, %v3104_v56 }
 0x270   : > { %v1089_v35 = vmul.f32 %v1057_v27, %v3068_v32  ;;  %v1090_v38 = vmul.f32 %v1058_v30, %v3080_v40  ;;  %v1091_v39 = vmul.f32 %v1059_v31, %v3062_v28  ;;  %v1063_v58 = vmul.f32 0.044715, %v3086_v44 }
 0x271   : > { %v1092_v42 = vmul.f32 %v1060_v34, %v3074_v36  ;;  %v1093_v50 = vmul.f32 %v1061_v25, %v3092_v48  ;;  %v1094_v55 = vmul.f32 %v1062_v43, %v3104_v56  ;;  %v1064_v15 = vmul.f32 0.044715, %v3098_v52 }
 0x272   : > { %v1121_v46 = vmul.f32 %v1089_v35, %v3068_v32  ;;  %v1122_v47 = vmul.f32 %v1090_v38, %v3080_v40  ;;  %v1123_v51 = vmul.f32 %v1091_v39, %v3062_v28  ;;  %v1095_v7 = vmul.f32 %v1063_v58, %v3086_v44 }
 0x273   : > { %v1124_v54 = vmul.f32 %v1092_v42, %v3074_v36  ;;  %v1125_v63 = vmul.f32 %v1093_v50, %v3092_v48  ;;  %v1126_v6 = vmul.f32 %v1094_v55, %v3104_v56  ;;  %v3382_v27 = vmul.f32 0.5, %v3068_v32 }
 0x274   : > { %v1153_v59 = vadd.f32 %v1121_v46, %v3068_v32  ;;  %v1154_v62 = vadd.f32 %v1122_v47, %v3080_v40  ;;  %v1155_v2 = vadd.f32 %v1123_v51, %v3062_v28  ;;  %v1127_v23 = vmul.f32 %v1095_v7, %v3086_v44 }
 0x275   : > { %v1156_v3 = vadd.f32 %v1124_v54, %v3074_v36  ;;  %v1157_v14 = vadd.f32 %v1125_v63, %v3092_v48  ;;  %v1158_v22 = vadd.f32 %v1126_v6, %v3104_v56  ;;  %v1096_v31 = vmul.f32 %v1064_v15, %v3098_v52 }
 0x276   : > { %v1185_v10 = vmul.f32 0.7978845, %v1153_v59  ;;  %v1186_v11 = vmul.f32 0.7978845, %v1154_v62  ;;  %v1187_v18 = vmul.f32 0.7978845, %v1155_v2  ;;  %v1159_v35 = vadd.f32 %v1127_v23, %v3086_v44 }
 0x277   : > { %v1188_v19 = vmul.f32 0.7978845, %v1156_v3  ;;  %v1189_v30 = vmul.f32 0.7978845, %v1157_v14  ;;  %v1190_v34 = vmul.f32 0.7978845, %v1158_v22  ;;  %v1128_v39 = vmul.f32 %v1096_v31, %v3098_v52 }
 0x278   : > { %2249 = vtanh.f32 %v1185_v10  ;;  %v1065_v38 = vmul.f32 0.044715, %v3116_v0  ;;  %v3388_v25 = vmul.f32 0.5, %v3080_v40  ;;  %v1066_v42 = vmul.f32 0.044715, %v3128_v8 }
 0x279   : > { %2251 = vtanh.f32 %v1186_v11  ;;  %v3393_v43 = vmul.f32 0.5, %v3062_v28  ;;  %v1191_v46 = vmul.f32 0.7978845, %v1159_v35  ;;  %v1160_v50 = vadd.f32 %v1128_v39, %v3098_v52 }
 0x27a   : > { %2253 = vtanh.f32 %v1187_v18  ;;  %v1097_v47 = vmul.f32 %v1065_v38, %v3116_v0  ;;  %v1098_v51 = vmul.f32 %v1066_v42, %v3128_v8  ;;  %v1067_v54 = vmul.f32 0.044715, %v3110_v60 }
 0x27b   : > { %2255 = vtanh.f32 %v1188_v19  ;;  %v3400_v55 = vmul.f32 0.5, %v3074_v36  ;;  %v1068_v59 = vmul.f32 0.044715, %v3122_v4  ;;  %v1192_v62 = vmul.f32 0.7978845, %v1160_v50 }
 0x27c   : > { %2257 = vtanh.f32 %v1189_v30  ;;  %v1129_v58 = vmul.f32 %v1097_v47, %v3116_v0  ;;  %v1130_v63 = vmul.f32 %v1098_v51, %v3128_v8  ;;  %v1099_v2 = vmul.f32 %v1067_v54, %v3110_v60 }
 0x27d   : > { %2259 = vtanh.f32 %v1190_v34  ;;  %v1029_v3 = vmul.f32 0.5, %v3092_v48  ;;  %v1100_v7 = vmul.f32 %v1068_v59, %v3122_v4  ;;  %v1069_v10 = vmul.f32 0.044715, %v3140_v16 }
 0x27e   : > { %2261 = vtanh.f32 %v1191_v46  ;;  %v1161_v6 = vadd.f32 %v1129_v58, %v3116_v0  ;;  %v3411_v11 = vmul.f32 0.5, %v3104_v56  ;;  %v1162_v14 = vadd.f32 %v1130_v63, %v3128_v8 }
 0x27f   : > { %2263 = vtanh.f32 %v1192_v62  ;;  %v1131_v15 = vmul.f32 %v1099_v2, %v3110_v60  ;;  %v1132_v19 = vmul.f32 %v1100_v7, %v3122_v4  ;;  %v1101_v22 = vmul.f32 %v1069_v10, %v3140_v16 }
 0x280   : > { %v1193_v18 = vmul.f32 0.7978845, %v1161_v6  ;;  %v1070_v23 = vmul.f32 0.044715, %v3152_v24  ;;  %v1031_v30 = vmul.f32 0.5, %v3086_v44  ;;  %v3425_v46 = vmul.f32 0.5, %v3098_v52 }
 0x281   : > { %v1194_v31 = vmul.f32 0.7978845, %v1162_v14  ;;  %v1163_v34 = vadd.f32 %v1131_v15, %v3110_v60  ;;  %v1071_v35 = vmul.f32 0.044715, %v3134_v12  ;;  %v1164_v38 = vadd.f32 %v1132_v19, %v3122_v4 }
 0x282   : > { %2265 = vtanh.f32 %v1193_v18  ;;  %v1133_v39 = vmul.f32 %v1101_v22, %v3140_v16  ;;  %v1102_v42 = vmul.f32 %v1070_v23, %v3152_v24  ;;  %v1072_v62 = vmul.f32 0.044715, %v3146_v20 }
 0x283   : > { %2267 = vtanh.f32 %v1194_v31  ;;  %v1195_v47 = vmul.f32 0.7978845, %v1163_v34  ;;  %v1103_v50 = vmul.f32 %v1071_v35, %v3134_v12  ;;  %v1196_v54 = vmul.f32 0.7978845, %v1164_v38 }
 0x284   : > { %v1165_v58 = vadd.f32 %v1133_v39, %v3140_v16  ;;  %v1134_v59 = vmul.f32 %v1102_v42, %v3152_v24  ;;  %v3432_v6 = vmul.f32 0.5, %v3116_v0  ;;  %v1104_v34 = vmul.f32 %v1072_v62, %v3146_v20 }
 0x285   : > { %v2250_v51 = vpop.eup %2249  ;;  %2269 = vtanh.f32 %v1195_v47  ;;  %v1135_v7 = vmul.f32 %v1103_v50, %v3134_v12 }
 0x286   : > { %v2252_v63 = vpop.eup %2251  ;;  %v1249_v2 = vadd.f32 1.0, %v2250_v51  ;;  %2271 = vtanh.f32 %v1196_v54  ;;  %v1197_v15 = vmul.f32 0.7978845, %v1165_v58  ;;  %v1166_v18 = vadd.f32 %v1134_v59, %v3152_v24 }
 0x287   : > { %v2254_v10 = vpop.eup %2253  ;;  %v1250_v14 = vadd.f32 1.0, %v2252_v63  ;;  %v1167_v31 = vadd.f32 %v1135_v7, %v3134_v12  ;;  %v1136_v54 = vmul.f32 %v1104_v34, %v3146_v20  ;;  %v1075_v34 = vmul.f32 0.044715, %v3065_v29 }
 0x288   : > { %v2256_v19 = vpop.eup %2255  ;;  %v1281_v22 = vmul.f32 %v1249_v2, %v3382_v27  ;;  %v1251_v23 = vadd.f32 1.0, %v2254_v10  ;;  %2273 = vtanh.f32 %v1197_v15  ;;  %v1198_v42 = vmul.f32 0.7978845, %v1166_v18 }
 0x289   : > { %v2258_v35 = vpop.eup %2257  ;;  %v1282_v38 = vmul.f32 %v1250_v14, %v3388_v25  ;;  %v1252_v39 = vadd.f32 1.0, %v2256_v19  ;;  %v1199_v27 = vmul.f32 0.7978845, %v1167_v31  ;;  %v1073_v25 = vmul.f32 0.044715, %v3071_v33 }
 0x28a   : > { %v2260_v47 = vpop.eup %2259  ;;  %1313 = vst [vmem:[%s2908_s23] sm:$0xff] %v1281_v22  ;;  %v1283_v50 = vmul.f32 %v1251_v23, %v3393_v43  ;;  %v1253_v51 = vadd.f32 1.0, %v2258_v35  ;;  %2275 = vtanh.f32 %v1198_v42  ;;  %v1168_v43 = vadd.f32 %v1136_v54, %v3146_v20 }
 0x28b   : > { %v2262_v58 = vpop.eup %2261  ;;  %1314 = vst [vmem:[%s2908_s23 + $0x8] sm:$0xff] %v1282_v38  ;;  %v1284_v59 = vmul.f32 %v1252_v39, %v3400_v55  ;;  %v1254_v62 = vadd.f32 1.0, %v2260_v47  ;;  %2277 = vtanh.f32 %v1199_v27  ;;  %v1034_v14 = vmul.f32 0.5, %v3128_v8 }
 0x28c   : > { %1315 = vst [vmem:[%s2908_s23 + $0x10] sm:$0xff] %v1283_v50  ;;  %v1285_v63 = vmul.f32 %v1253_v51, %v1029_v3  ;;  %v1255_v2 = vadd.f32 1.0, %v2262_v58  ;;  %v2264_v7 = vpop.eup %2263  ;;  %v1105_v55 = vmul.f32 %v1073_v25, %v3071_v33  ;;  %v1074_v15 = vmul.f32 0.044715, %v3083_v41 }
 0x28d   : > { %1316 = vst [vmem:[%s2908_s23 + $0x18] sm:$0xff] %v1284_v59  ;;  %v1286_v10 = vmul.f32 %v1254_v62, %v3411_v11  ;;  %v1256_v19 = vadd.f32 1.0, %v2264_v7  ;;  %v1035_v3 = vmul.f32 0.5, %v3110_v60  ;;  %v1200_v22 = vmul.f32 0.7978845, %v1168_v43 }
 0x28e   : > { %1317 = vst [vmem:[%s2908_s23 + $0x20] sm:$0xff] %v1285_v63  ;;  %v1287_v18 = vmul.f32 %v1255_v2, %v1031_v30  ;;  %v1036_v23 = vmul.f32 0.5, %v3122_v4  ;;  %v1137_v31 = vmul.f32 %v1105_v55, %v3071_v33  ;;  %v1106_v11 = vmul.f32 %v1074_v15, %v3083_v41 }
 0x28f   : > { %1318 = vst [vmem:[%s2908_s23 + $0x28] sm:$0xff] %v1286_v10  ;;  %v2266_v35 = vpop.eup %2265  ;;  %v1288_v38 = vmul.f32 %v1256_v19, %v3425_v46  ;;  %v1037_v30 = vmul.f32 0.5, %v3140_v16  ;;  %2279 = vtanh.f32 %v1200_v22  ;;  %v1076_v39 = vmul.f32 0.044715, %v3077_v37 }
 0x290   : > { %1319 = vst [vmem:[%s2908_s23 + $0x30] sm:$0xff] %v1287_v18  ;;  %v2268_v42 = vpop.eup %2267  ;;  %v1257_v47 = vadd.f32 1.0, %v2266_v35  ;;  %v1169_v50 = vadd.f32 %v1137_v31, %v3071_v33  ;;  %v1138_v51 = vmul.f32 %v1106_v11, %v3083_v41  ;;  %v1107_v27 = vmul.f32 %v1075_v34, %v3065_v29 }
 0x291   : > { %1320 = vst [vmem:[%s2908_s23 + $0x38] sm:$0xff] %v1288_v38  ;;  %v1258_v54 = vadd.f32 1.0, %v2268_v42  ;;  %v1038_v58 = vmul.f32 0.5, %v3152_v24  ;;  %v1108_v46 = vmul.f32 %v1076_v39, %v3077_v37  ;;  %v1077_v59 = vmul.f32 0.044715, %v3095_v49 }
 0x292   : > { %v2270_v62 = vpop.eup %2269  ;;  %v1289_v25 = vmul.f32 %v1257_v47, %v3432_v6  ;;  %v1201_v63 = vmul.f32 0.7978845, %v1169_v50  ;;  %v1170_v2 = vadd.f32 %v1138_v51, %v3083_v41  ;;  %v1139_v43 = vmul.f32 %v1107_v27, %v3065_v29 }
 0x293   : > { %v2272_v7 = vpop.eup %2271  ;;  %v1290_v10 = vmul.f32 %v1258_v54, %v1034_v14  ;;  %v1259_v55 = vadd.f32 1.0, %v2270_v62  ;;  %v1140_v15 = vmul.f32 %v1108_v46, %v3077_v37  ;;  %v1109_v18 = vmul.f32 %v1077_v59, %v3095_v49 }
 0x294   : > { %1321 = vst [vmem:[%s2908_s23 + $0x40] sm:$0xff] %v1289_v25  ;;  %v1260_v19 = vadd.f32 1.0, %v2272_v7  ;;  %2281 = vtanh.f32 %v1201_v63  ;;  %v1202_v22 = vmul.f32 0.7978845, %v1170_v2  ;;  %v1171_v31 = vadd.f32 %v1139_v43, %v3065_v29 }
 0x295   : > { %v2274_v6 = vpop.eup %2273  ;;  %1322 = vst [vmem:[%s2908_s23 + $0x48] sm:$0xff] %v1290_v10  ;;  %v1291_v11 = vmul.f32 %v1259_v55, %v1035_v3  ;;  %v1172_v34 = vadd.f32 %v1140_v15, %v3077_v37  ;;  %v1141_v14 = vmul.f32 %v1109_v18, %v3095_v49  ;;  %v1078_v35 = vmul.f32 0.044715, %v3107_v57 }
 0x296   : > { %v1292_v38 = vmul.f32 %v1260_v19, %v1036_v23  ;;  %v1261_v39 = vadd.f32 1.0, %v2274_v6  ;;  %2283 = vtanh.f32 %v1202_v22  ;;  %v1203_v42 = vmul.f32 0.7978845, %v1171_v31 }
 0x297   : > { %v2276_v47 = vpop.eup %2275  ;;  %1323 = vst [vmem:[%s2908_s23 + $0x50] sm:$0xff] %v1291_v11  ;;  %v1039_v50 = vmul.f32 0.5, %v3134_v12  ;;  %v1204_v51 = vmul.f32 0.7978845, %v1172_v34  ;;  %v1173_v27 = vadd.f32 %v1141_v14, %v3095_v49  ;;  %v1110_v3 = vmul.f32 %v1078_v35, %v3107_v57 }
 0x298   : > { %v2278_v54 = vpop.eup %2277  ;;  %1324 = vst [vmem:[%s2908_s23 + $0x58] sm:$0xff] %v1292_v38  ;;  %v1293_v46 = vmul.f32 %v1261_v39, %v1037_v30  ;;  %v1262_v59 = vadd.f32 1.0, %v2276_v47  ;;  %2285 = vtanh.f32 %v1203_v42  ;;  %v1079_v23 = vmul.f32 0.044715, %v3089_v45 }
 0x299   : > { %v1263_v62 = vadd.f32 1.0, %v2278_v54  ;;  %2287 = vtanh.f32 %v1204_v51  ;;  %v1205_v25 = vmul.f32 0.7978845, %v1173_v27  ;;  %v1142_v63 = vmul.f32 %v1110_v3, %v3107_v57 }
 0x29a   : > { %1325 = vst [vmem:[%s2908_s23 + $0x60] sm:$0xff] %v1293_v46  ;;  %v1294_v2 = vmul.f32 %v1262_v59, %v1038_v58  ;;  %v1111_v43 = vmul.f32 %v1079_v23, %v3089_v45  ;;  %v1080_v7 = vmul.f32 0.044715, %v3101_v53  ;;  %v1040_v30 = vmul.f32 0.5, %v3146_v20 }
 0x29b   : > { %v1295_v10 = vmul.f32 %v1263_v62, %v1039_v50  ;;  %2289 = vtanh.f32 %v1205_v25  ;;  %v1174_v55 = vadd.f32 %v1142_v63, %v3107_v57  ;;  %v1041_v18 = vmul.f32 0.5, %v3071_v33 }
 0x29c   : > { %v2280_v15 = vpop.eup %2279  ;;  %1326 = vst [vmem:[%s2908_s23 + $0x68] sm:$0xff] %v1294_v2  ;;  %v1143_v19 = vmul.f32 %v1111_v43, %v3089_v45  ;;  %v1112_v22 = vmul.f32 %v1080_v7, %v3101_v53  ;;  %v1081_v58 = vmul.f32 0.044715, %v3119_v1  ;;  %v1042_v6 = vmul.f32 0.5, %v3083_v41 }
 0x29d   : > { %1327 = vst [vmem:[%s2908_s23 + $0x70] sm:$0xff] %v1295_v10  ;;  %v1264_v31 = vadd.f32 1.0, %v2280_v15  ;;  %v1206_v11 = vmul.f32 0.7978845, %v1174_v55  ;;  %v1082_v34 = vmul.f32 0.044715, %v3131_v9 }
 0x29e   : > { %v1175_v14 = vadd.f32 %v1143_v19, %v3089_v45  ;;  %v1144_v35 = vmul.f32 %v1112_v22, %v3101_v53  ;;  %v1113_v38 = vmul.f32 %v1081_v58, %v3119_v1  ;;  %v1083_v39 = vmul.f32 0.044715, %v3113_v61 }
 0x29f   : > { %v1296_v42 = vmul.f32 %v1264_v31, %v1040_v30  ;;  %v1043_v47 = vmul.f32 0.5, %v3065_v29  ;;  %2291 = vtanh.f32 %v1206_v11  ;;  %v1114_v50 = vmul.f32 %v1082_v34, %v3131_v9 }
 0x2a0   : > { %v1207_v51 = vmul.f32 0.7978845, %v1175_v14  ;;  %v1176_v27 = vadd.f32 %v1144_v35, %v3101_v53  ;;  %v1145_v3 = vmul.f32 %v1113_v38, %v3119_v1  ;;  %v1115_v54 = vmul.f32 %v1083_v39, %v3113_v61 }
 0x2a1   : > { %v2282_v46 = vpop.eup %2281  ;;  %1328 = vst [vmem:[%s2908_s23 + $0x78] sm:$0xff] %v1296_v42  ;;  %v1044_v59 = vmul.f32 0.5, %v3077_v37  ;;  %v1146_v23 = vmul.f32 %v1114_v50, %v3131_v9  ;;  %v1084_v62 = vmul.f32 0.044715, %v3125_v5  ;;  %v1085_v25 = vmul.f32 0.044715, %v3143_v17 }
 0x2a2   : > { %v1265_v63 = vadd.f32 1.0, %v2282_v46  ;;  %2293 = vtanh.f32 %v1207_v51  ;;  %v1208_v2 = vmul.f32 0.7978845, %v1176_v27  ;;  %v1177_v43 = vadd.f32 %v1145_v3, %v3119_v1 }
 0x2a3   : > { %v2284_v7 = vpop.eup %2283  ;;  %v1178_v10 = vadd.f32 %v1146_v23, %v3131_v9  ;;  %v1147_v30 = vmul.f32 %v1115_v54, %v3113_v61  ;;  %v1116_v55 = vmul.f32 %v1084_v62, %v3125_v5  ;;  %v1117_v15 = vmul.f32 %v1085_v25, %v3143_v17 }
 0x2a4   : > { %v1297_v19 = vmul.f32 %v1265_v63, %v1041_v18  ;;  %v1266_v22 = vadd.f32 1.0, %v2284_v7  ;;  %2295 = vtanh.f32 %v1208_v2  ;;  %v1209_v58 = vmul.f32 0.7978845, %v1177_v43 }
 0x2a5   : > { %v2286_v31 = vpop.eup %2285  ;;  %v1210_v11 = vmul.f32 0.7978845, %v1178_v10  ;;  %v1179_v34 = vadd.f32 %v1147_v30, %v3113_v61  ;;  %v1148_v14 = vmul.f32 %v1116_v55, %v3125_v5  ;;  %v1149_v35 = vmul.f32 %v1117_v15, %v3143_v17 }
 0x2a6   : > { %v2288_v38 = vpop.eup %2287  ;;  %1329 = vst [vmem:[%s2908_s23 + $0x80] sm:$0xff] %v1297_v19  ;;  %v1298_v39 = vmul.f32 %v1266_v22, %v1042_v6  ;;  %v1267_v42 = vadd.f32 1.0, %v2286_v31  ;;  %v1045_v50 = vmul.f32 0.5, %v3095_v49  ;;  %2297 = vtanh.f32 %v1209_v58 }
 0x2a7   : > { %v1268_v18 = vadd.f32 1.0, %v2288_v38  ;;  %2299 = vtanh.f32 %v1210_v11  ;;  %v1211_v51 = vmul.f32 0.7978845, %v1179_v34  ;;  %v1180_v27 = vadd.f32 %v1148_v14, %v3125_v5 }
 0x2a8   : > { %v2290_v3 = vpop.eup %2289  ;;  %1330 = vst [vmem:[%s2908_s23 + $0x88] sm:$0xff] %v1298_v39  ;;  %v1299_v54 = vmul.f32 %v1267_v42, %v1043_v47  ;;  %v1181_v46 = vadd.f32 %v1149_v35, %v3143_v17  ;;  %v1086_v23 = vmul.f32 0.044715, %v3155_v26  ;;  %v1087_v43 = vmul.f32 0.044715, %v3137_v13 }
 0x2a9   : > { %v1300_v62 = vmul.f32 %v1268_v18, %v1044_v59  ;;  %v1269_v6 = vadd.f32 1.0, %v2290_v3  ;;  %2301 = vtanh.f32 %v1211_v51  ;;  %v1212_v25 = vmul.f32 0.7978845, %v1180_v27 }
 0x2aa   : > { %1331 = vst [vmem:[%s2908_s23 + $0x90] sm:$0xff] %v1299_v54  ;;  %v1213_v63 = vmul.f32 0.7978845, %v1181_v46  ;;  %v1118_v2 = vmul.f32 %v1086_v23, %v3155_v26  ;;  %v1046_v10 = vmul.f32 0.5, %v3107_v57  ;;  %v1088_v47 = vmul.f32 0.044715, %v3149_v21 }
 0x2ab   : > { %1332 = vst [vmem:[%s2908_s23 + $0x98] sm:$0xff] %v1300_v62  ;;  %v1301_v7 = vmul.f32 %v1269_v6, %v1045_v50  ;;  %2303 = vtanh.f32 %v1212_v25  ;;  %v1119_v55 = vmul.f32 %v1087_v43, %v3137_v13  ;;  %v1047_v22 = vmul.f32 0.5, %v3089_v45 }
 0x2ac   : > { %v2292_v30 = vpop.eup %2291  ;;  %2305 = vtanh.f32 %v1213_v63  ;;  %v1150_v59 = vmul.f32 %v1118_v2, %v3155_v26  ;;  %v1120_v19 = vmul.f32 %v1088_v47, %v3149_v21  ;;  %v1048_v38 = vmul.f32 0.5, %v3101_v53 }
 0x2ad   : > { %1333 = vst [vmem:[%s2908_s23 + $0xa0] sm:$0xff] %v1301_v7  ;;  %v1270_v15 = vadd.f32 1.0, %v2292_v30  ;;  %v1151_v31 = vmul.f32 %v1119_v55, %v3137_v13  ;;  %v1049_v18 = vmul.f32 0.5, %v3119_v1  ;;  %v1050_v23 = vmul.f32 0.5, %v3131_v9 }
 0x2ae   : > { %v1182_v58 = vadd.f32 %v1150_v59, %v3155_v26  ;;  %v1152_v14 = vmul.f32 %v1120_v19, %v3149_v21  ;;  %v1051_v43 = vmul.f32 0.5, %v3113_v61  ;;  %v1052_v59 = vmul.f32 0.5, %v3125_v5 }
 0x2af   : > { %v2294_v11 = vpop.eup %2293  ;;  %v1302_v34 = vmul.f32 %v1270_v15, %v1046_v10  ;;  %v1183_v42 = vadd.f32 %v1151_v31, %v3137_v13  ;;  %v1053_v15 = vmul.f32 0.5, %v3143_v17 }
 0x2b0   : > { %v1271_v35 = vadd.f32 1.0, %v2294_v11  ;;  %v1214_v39 = vmul.f32 0.7978845, %v1182_v58  ;;  %v1184_v51 = vadd.f32 %v1152_v14, %v3149_v21  ;;  %v1054_v14 = vmul.f32 0.5, %v3155_v26 }
 0x2b1   : > { %v2296_v50 = vpop.eup %2295  ;;  %1334 = vst [vmem:[%s2908_s23 + $0xa8] sm:$0xff] %v1302_v34  ;;  %v1215_v54 = vmul.f32 0.7978845, %v1183_v42 }
 0x2b2   : > { %v1303_v27 = vmul.f32 %v1271_v35, %v1047_v22  ;;  %v1272_v3 = vadd.f32 1.0, %v2296_v50  ;;  %2307 = vtanh.f32 %v1214_v39  ;;  %v1216_v62 = vmul.f32 0.7978845, %v1184_v51 }
 0x2b3   : > { %v2298_v46 = vpop.eup %2297  ;;  %2309 = vtanh.f32 %v1215_v54  ;;  %v1055_v39 = vmul.f32 0.5, %v3137_v13  ;;  %v1056_v50 = vmul.f32 0.5, %v3149_v21 }
 0x2b4   : > { %v2300_v6 = vpop.eup %2299  ;;  %1335 = vst [vmem:[%s2908_s23 + $0xb0] sm:$0xff] %v1303_v27  ;;  %v1304_v25 = vmul.f32 %v1272_v3, %v1048_v38  ;;  %v1273_v63 = vadd.f32 1.0, %v2298_v46  ;;  %2311 = vtanh.f32 %v1216_v62 }
 0x2b5   : > { %v1274_v2 = vadd.f32 1.0, %v2300_v6 }
 0x2b6   : > { %v2302_v7 = vpop.eup %2301  ;;  %1336 = vst [vmem:[%s2908_s23 + $0xb8] sm:$0xff] %v1304_v25  ;;  %v1305_v10 = vmul.f32 %v1273_v63, %v1049_v18 }
 0x2b7   : > { %v1306_v47 = vmul.f32 %v1274_v2, %v1050_v23  ;;  %v1275_v30 = vadd.f32 1.0, %v2302_v7 }
 0x2b8   : > { %v2304_v55 = vpop.eup %2303  ;;  %1337 = vst [vmem:[%s2908_s23 + $0xc0] sm:$0xff] %v1305_v10 }
 0x2b9   : > { %v2306_v19 = vpop.eup %2305  ;;  %1338 = vst [vmem:[%s2908_s23 + $0xc8] sm:$0xff] %v1306_v47  ;;  %v1307_v22 = vmul.f32 %v1275_v30, %v1051_v43  ;;  %v1276_v58 = vadd.f32 1.0, %v2304_v55 }
 0x2ba   : > { %v1277_v31 = vadd.f32 1.0, %v2306_v19 }
 0x2bb   : > { %1339 = vst [vmem:[%s2908_s23 + $0xd0] sm:$0xff] %v1307_v22  ;;  %v1308_v11 = vmul.f32 %v1276_v58, %v1052_v59 }
 0x2bc   : > { %v1309_v34 = vmul.f32 %v1277_v31, %v1053_v15 }
 0x2bd   : > { %1340 = vst [vmem:[%s2908_s23 + $0xd8] sm:$0xff] %v1308_v11 }
 0x2be   : > { %1341 = vst [vmem:[%s2908_s23 + $0xe0] sm:$0xff] %v1309_v34 }
 0x2bf   : > { %v2308_v35 = vpop.eup %2307 }
 0x2c0   : > { %v1278_v38 = vadd.f32 1.0, %v2308_v35  ;;  %v2310_v42 = vpop.eup %2309 }
 0x2c1   : > { %v2312_v18 = vpop.eup %2311  ;;  %v1279_v27 = vadd.f32 1.0, %v2310_v42 }
 0x2c2   : > { %v1310_v51 = vmul.f32 %v1278_v38, %v1054_v14  ;;  %v1280_v3 = vadd.f32 1.0, %v2312_v18 }
 0x2c3   : > { %v1311_v54 = vmul.f32 %v1279_v27, %v1055_v39 }
 0x2c4   : > { %1342 = vst [vmem:[%s2908_s23 + $0xe8] sm:$0xff] %v1310_v51  ;;  %v1312_v46 = vmul.f32 %v1280_v3, %v1056_v50 }
 0x2c5   : > { %1343 = vst [vmem:[%s2908_s23 + $0xf0] sm:$0xff] %v1311_v54 }
 0x2c6   : > { %1344 = vst [vmem:[%s2908_s23 + $0xf8] sm:$0xff] %v1312_v46 }
 0x2c7 PF: > { %p1798_p4 = scmp.ne.s32.totalorder %s3056_s24, 4 }
 0x2c9   : > { %1348 = sbr.rel (%p1798_p4) target bundleno = 800 (0x320), region = 76 }
 0x2ce   : > { %v1799_v23 = vmul.f32 -1.442695, %v3068_v32  ;;  %v1800_v62 = vmul.f32 -1.442695, %v3080_v40  ;;  %v1801_v6 = vmul.f32 -1.442695, %v3062_v28 }
 0x2cf   : > { %v1802_v25 = vmul.f32 -1.442695, %v3074_v36  ;;  %v1803_v63 = vmul.f32 -1.442695, %v3092_v48  ;;  %v1804_v2 = vmul.f32 -1.442695, %v3104_v56 }
 0x2d0   : > { %2313 = vpow2.f32 %v1799_v23  ;;  %v1805_v43 = vmul.f32 -1.442695, %v3086_v44  ;;  %v1806_v7 = vmul.f32 -1.442695, %v3098_v52  ;;  %v1807_v10 = vmul.f32 -1.442695, %v3116_v0 }
 0x2d1   : > { %2315 = vpow2.f32 %v1800_v62  ;;  %v1808_v47 = vmul.f32 -1.442695, %v3128_v8  ;;  %v1809_v30 = vmul.f32 -1.442695, %v3110_v60  ;;  %v1810_v59 = vmul.f32 -1.442695, %v3122_v4 }
 0x2d2   : > { %2317 = vpow2.f32 %v1801_v6  ;;  %v1811_v55 = vmul.f32 -1.442695, %v3140_v16  ;;  %v1812_v15 = vmul.f32 -1.442695, %v3152_v24  ;;  %v1813_v19 = vmul.f32 -1.442695, %v3134_v12 }
 0x2d3   : > { %2319 = vpow2.f32 %v1802_v25  ;;  %v1814_v22 = vmul.f32 -1.442695, %v3146_v20 }
 0x2d4   : > { %2321 = vpow2.f32 %v1803_v63 }
 0x2d5   : > { %2323 = vpow2.f32 %v1804_v2 }
 0x2d6   : > { %2325 = vpow2.f32 %v1805_v43 }
 0x2d7   : > { %2327 = vpow2.f32 %v1806_v7 }
 0x2d8   : > { %2329 = vpow2.f32 %v1807_v10 }
 0x2d9   : > { %2331 = vpow2.f32 %v1808_v47 }
 0x2da   : > { %2333 = vpow2.f32 %v1809_v30 }
 0x2db   : > { %2335 = vpow2.f32 %v1810_v59 }
 0x2dc   : > { %2337 = vpow2.f32 %v1811_v55 }
 0x2dd   : > { %v2314_v58 = vpop.eup %2313  ;;  %2339 = vpow2.f32 %v1812_v15 }
 0x2de   : > { %v2316_v31 = vpop.eup %2315  ;;  %v1445_v11 = vadd.f32 1.0, %v2314_v58  ;;  %2341 = vpow2.f32 %v1813_v19 }
 0x2df   : > { %v2318_v34 = vpop.eup %2317  ;;  %v1446_v14 = vadd.f32 1.0, %v2316_v31  ;;  %2343 = vpow2.f32 %v1814_v22  ;;  %v1815_v22 = vmul.f32 -1.442695, %v3071_v33 }
 0x2e0   : > { %v2320_v35 = vpop.eup %2319  ;;  %2345 = vrcp.f32 %v1445_v11  ;;  %v1447_v38 = vadd.f32 1.0, %v2318_v34  ;;  %v1816_v11 = vmul.f32 -1.442695, %v3083_v41 }
 0x2e1   : > { %v2322_v39 = vpop.eup %2321  ;;  %2347 = vrcp.f32 %v1446_v14  ;;  %v1448_v42 = vadd.f32 1.0, %v2320_v35  ;;  %v1817_v35 = vmul.f32 -1.442695, %v3065_v29 }
 0x2e2   : > { %v2324_v50 = vpop.eup %2323  ;;  %2349 = vrcp.f32 %v1447_v38  ;;  %v1449_v18 = vadd.f32 1.0, %v2322_v39 }
 0x2e3   : > { %v2326_v51 = vpop.eup %2325  ;;  %2351 = vrcp.f32 %v1448_v42  ;;  %v1450_v27 = vadd.f32 1.0, %v2324_v50  ;;  %v1818_v42 = vmul.f32 -1.442695, %v3077_v37 }
 0x2e4   : > { %v2328_v3 = vpop.eup %2327  ;;  %2353 = vrcp.f32 %v1449_v18  ;;  %v1451_v54 = vadd.f32 1.0, %v2326_v51  ;;  %v1819_v51 = vmul.f32 -1.442695, %v3095_v49 }
 0x2e5   : > { %v2330_v46 = vpop.eup %2329  ;;  %2355 = vrcp.f32 %v1450_v27  ;;  %v1452_v23 = vadd.f32 1.0, %v2328_v3  ;;  %v1820_v3 = vmul.f32 -1.442695, %v3107_v57 }
 0x2e6   : > { %v2332_v62 = vpop.eup %2331  ;;  %2357 = vrcp.f32 %v1451_v54  ;;  %v1453_v6 = vadd.f32 1.0, %v2330_v46  ;;  %v1821_v46 = vmul.f32 -1.442695, %v3089_v45 }
 0x2e7   : > { %v2334_v25 = vpop.eup %2333  ;;  %2359 = vrcp.f32 %v1452_v23  ;;  %v1454_v63 = vadd.f32 1.0, %v2332_v62  ;;  %v1822_v62 = vmul.f32 -1.442695, %v3101_v53 }
 0x2e8   : > { %v2336_v2 = vpop.eup %2335  ;;  %2361 = vrcp.f32 %v1453_v6  ;;  %v1455_v43 = vadd.f32 1.0, %v2334_v25  ;;  %v1823_v25 = vmul.f32 -1.442695, %v3119_v1 }
 0x2e9   : > { %v2338_v7 = vpop.eup %2337  ;;  %2363 = vrcp.f32 %v1454_v63  ;;  %v1456_v10 = vadd.f32 1.0, %v2336_v2  ;;  %v1824_v2 = vmul.f32 -1.442695, %v3131_v9 }
 0x2ea   : > { %v2340_v47 = vpop.eup %2339  ;;  %2365 = vrcp.f32 %v1455_v43  ;;  %v1457_v30 = vadd.f32 1.0, %v2338_v7  ;;  %v1825_v7 = vmul.f32 -1.442695, %v3113_v61 }
 0x2eb   : > { %v2342_v59 = vpop.eup %2341  ;;  %2367 = vrcp.f32 %v1456_v10  ;;  %v1458_v55 = vadd.f32 1.0, %v2340_v47  ;;  %v1826_v47 = vmul.f32 -1.442695, %v3125_v5 }
 0x2ec   : > { %v2344_v15 = vpop.eup %2343  ;;  %2369 = vrcp.f32 %v1457_v30  ;;  %v1459_v19 = vadd.f32 1.0, %v2342_v59  ;;  %v1827_v59 = vmul.f32 -1.442695, %v3143_v17 }
 0x2ed   : > { %v2346_v58 = vpop.eup %2345  ;;  %2371 = vrcp.f32 %v1458_v55  ;;  %v1460_v31 = vadd.f32 1.0, %v2344_v15  ;;  %v1828_v15 = vmul.f32 -1.442695, %v3155_v26 }
 0x2ee   : > { %v2348_v34 = vpop.eup %2347  ;;  %v1541_v14 = vmul.f32 %v2346_v58, %v3068_v32  ;;  %2373 = vrcp.f32 %v1459_v19 }
 0x2ef   : > { %v2350_v38 = vpop.eup %2349  ;;  %v1542_v39 = vmul.f32 %v2348_v34, %v3080_v40  ;;  %2375 = vrcp.f32 %v1460_v31 }
 0x2f0   : > { %v2352_v50 = vpop.eup %2351  ;;  %1573 = vst [vmem:[%s2908_s23] sm:$0xff] %v1541_v14  ;;  %v1543_v18 = vmul.f32 %v2350_v38, %v3062_v28  ;;  %2377 = vpow2.f32 %v1815_v22 }
 0x2f1   : > { %v2354_v27 = vpop.eup %2353  ;;  %1574 = vst [vmem:[%s2908_s23 + $0x8] sm:$0xff] %v1542_v39  ;;  %v1544_v32 = vmul.f32 %v2352_v50, %v3074_v36  ;;  %2379 = vpow2.f32 %v1816_v11 }
 0x2f2   : > { %v2356_v40 = vpop.eup %2355  ;;  %1575 = vst [vmem:[%s2908_s23 + $0x10] sm:$0xff] %v1543_v18  ;;  %v1545_v54 = vmul.f32 %v2354_v27, %v3092_v48  ;;  %2381 = vpow2.f32 %v1817_v35 }
 0x2f3   : > { %v2358_v28 = vpop.eup %2357  ;;  %1576 = vst [vmem:[%s2908_s23 + $0x18] sm:$0xff] %v1544_v32  ;;  %v1546_v23 = vmul.f32 %v2356_v40, %v3104_v56  ;;  %2383 = vpow2.f32 %v1818_v42 }
 0x2f4   : > { %v2360_v36 = vpop.eup %2359  ;;  %1577 = vst [vmem:[%s2908_s23 + $0x20] sm:$0xff] %v1545_v54  ;;  %v1547_v6 = vmul.f32 %v2358_v28, %v3086_v44  ;;  %2385 = vpow2.f32 %v1819_v51 }
 0x2f5   : > { %v2362_v48 = vpop.eup %2361  ;;  %1578 = vst [vmem:[%s2908_s23 + $0x28] sm:$0xff] %v1546_v23  ;;  %v1548_v63 = vmul.f32 %v2360_v36, %v3098_v52  ;;  %2387 = vpow2.f32 %v1820_v3 }
 0x2f6   : > { %v2364_v56 = vpop.eup %2363  ;;  %1579 = vst [vmem:[%s2908_s23 + $0x30] sm:$0xff] %v1547_v6  ;;  %v1549_v43 = vmul.f32 %v2362_v48, %v3116_v0  ;;  %2389 = vpow2.f32 %v1821_v46 }
 0x2f7   : > { %v2366_v44 = vpop.eup %2365  ;;  %1580 = vst [vmem:[%s2908_s23 + $0x38] sm:$0xff] %v1548_v63  ;;  %v1550_v10 = vmul.f32 %v2364_v56, %v3128_v8  ;;  %2391 = vpow2.f32 %v1822_v62 }
 0x2f8   : > { %v2368_v52 = vpop.eup %2367  ;;  %1581 = vst [vmem:[%s2908_s23 + $0x40] sm:$0xff] %v1549_v43  ;;  %v1551_v30 = vmul.f32 %v2366_v44, %v3110_v60  ;;  %2393 = vpow2.f32 %v1823_v25  ;;  %v1829_v60 = vmul.f32 -1.442695, %v3137_v13 }
 0x2f9   : > { %v2370_v0 = vpop.eup %2369  ;;  %1582 = vst [vmem:[%s2908_s23 + $0x48] sm:$0xff] %v1550_v10  ;;  %v1552_v55 = vmul.f32 %v2368_v52, %v3122_v4  ;;  %2395 = vpow2.f32 %v1824_v2  ;;  %v1830_v4 = vmul.f32 -1.442695, %v3149_v21 }
 0x2fa   : > { %v2372_v8 = vpop.eup %2371  ;;  %1583 = vst [vmem:[%s2908_s23 + $0x50] sm:$0xff] %v1551_v30  ;;  %v1553_v19 = vmul.f32 %v2370_v0, %v3140_v16  ;;  %2397 = vpow2.f32 %v1825_v7 }
 0x2fb   : > { %v2374_v22 = vpop.eup %2373  ;;  %1584 = vst [vmem:[%s2908_s23 + $0x58] sm:$0xff] %v1552_v55  ;;  %v1554_v58 = vmul.f32 %v2372_v8, %v3152_v24  ;;  %2399 = vpow2.f32 %v1826_v47 }
 0x2fc   : > { %v2376_v31 = vpop.eup %2375  ;;  %1585 = vst [vmem:[%s2908_s23 + $0x60] sm:$0xff] %v1553_v19  ;;  %v1555_v11 = vmul.f32 %v2374_v22, %v3134_v12  ;;  %2401 = vpow2.f32 %v1827_v59 }
 0x2fd   : > { %v2378_v34 = vpop.eup %2377  ;;  %1586 = vst [vmem:[%s2908_s23 + $0x68] sm:$0xff] %v1554_v58  ;;  %v1556_v16 = vmul.f32 %v2376_v31, %v3146_v20  ;;  %2403 = vpow2.f32 %v1828_v15 }
 0x2fe   : > { %v2380_v14 = vpop.eup %2379  ;;  %1587 = vst [vmem:[%s2908_s23 + $0x70] sm:$0xff] %v1555_v11  ;;  %v1461_v35 = vadd.f32 1.0, %v2378_v34  ;;  %2405 = vpow2.f32 %v1829_v60 }
 0x2ff   : > { %v2382_v38 = vpop.eup %2381  ;;  %1588 = vst [vmem:[%s2908_s23 + $0x78] sm:$0xff] %v1556_v16  ;;  %v1462_v24 = vadd.f32 1.0, %v2380_v14  ;;  %2407 = vpow2.f32 %v1830_v4 }
 0x300   : > { %v2384_v39 = vpop.eup %2383  ;;  %2409 = vrcp.f32 %v1461_v35  ;;  %v1463_v42 = vadd.f32 1.0, %v2382_v38 }
 0x301   : > { %v2386_v50 = vpop.eup %2385  ;;  %2411 = vrcp.f32 %v1462_v24  ;;  %v1464_v12 = vadd.f32 1.0, %v2384_v39 }
 0x302   : > { %v2388_v18 = vpop.eup %2387  ;;  %2413 = vrcp.f32 %v1463_v42  ;;  %v1465_v51 = vadd.f32 1.0, %v2386_v50 }
 0x303   : > { %v2390_v27 = vpop.eup %2389  ;;  %2415 = vrcp.f32 %v1464_v12  ;;  %v1466_v20 = vadd.f32 1.0, %v2388_v18 }
 0x304   : > { %v2392_v32 = vpop.eup %2391  ;;  %2417 = vrcp.f32 %v1465_v51  ;;  %v1467_v3 = vadd.f32 1.0, %v2390_v27 }
 0x305   : > { %v2394_v40 = vpop.eup %2393  ;;  %2419 = vrcp.f32 %v1466_v20  ;;  %v1468_v54 = vadd.f32 1.0, %v2392_v32 }
 0x306   : > { %v2396_v46 = vpop.eup %2395  ;;  %2421 = vrcp.f32 %v1467_v3  ;;  %v1469_v28 = vadd.f32 1.0, %v2394_v40 }
 0x307   : > { %v2398_v23 = vpop.eup %2397  ;;  %2423 = vrcp.f32 %v1468_v54  ;;  %v1470_v62 = vadd.f32 1.0, %v2396_v46 }
 0x308   : > { %v2400_v36 = vpop.eup %2399  ;;  %2425 = vrcp.f32 %v1469_v28  ;;  %v1471_v6 = vadd.f32 1.0, %v2398_v23 }
 0x309   : > { %v2402_v25 = vpop.eup %2401  ;;  %2427 = vrcp.f32 %v1470_v62  ;;  %v1472_v48 = vadd.f32 1.0, %v2400_v36 }
 0x30a   : > { %v2404_v63 = vpop.eup %2403  ;;  %2429 = vrcp.f32 %v1471_v6  ;;  %v1473_v2 = vadd.f32 1.0, %v2402_v25 }
 0x30b   : > { %v2406_v56 = vpop.eup %2405  ;;  %2431 = vrcp.f32 %v1472_v48  ;;  %v1474_v43 = vadd.f32 1.0, %v2404_v63 }
 0x30c   : > { %v2408_v7 = vpop.eup %2407  ;;  %2433 = vrcp.f32 %v1473_v2  ;;  %v1475_v44 = vadd.f32 1.0, %v2406_v56 }
 0x30d   : > { %v2410_v10 = vpop.eup %2409  ;;  %2435 = vrcp.f32 %v1474_v43  ;;  %v1476_v47 = vadd.f32 1.0, %v2408_v7 }
 0x30e   : > { %v2412_v52 = vpop.eup %2411  ;;  %v1557_v30 = vmul.f32 %v2410_v10, %v3071_v33  ;;  %2437 = vrcp.f32 %v1475_v44 }
 0x30f   : > { %v2414_v59 = vpop.eup %2413  ;;  %v1558_v0 = vmul.f32 %v2412_v52, %v3083_v41  ;;  %2439 = vrcp.f32 %v1476_v47 }
 0x310   : > { %v2416_v55 = vpop.eup %2415  ;;  %1589 = vst [vmem:[%s2908_s23 + $0x80] sm:$0xff] %v1557_v30  ;;  %v1559_v15 = vmul.f32 %v2414_v59, %v3065_v29 }
 0x311   : > { %v2418_v8 = vpop.eup %2417  ;;  %1590 = vst [vmem:[%s2908_s23 + $0x88] sm:$0xff] %v1558_v0  ;;  %v1560_v19 = vmul.f32 %v2416_v55, %v3077_v37 }
 0x312   : > { %v2420_v60 = vpop.eup %2419  ;;  %1591 = vst [vmem:[%s2908_s23 + $0x90] sm:$0xff] %v1559_v15  ;;  %v1561_v33 = vmul.f32 %v2418_v8, %v3095_v49 }
 0x313   : > { %v2422_v22 = vpop.eup %2421  ;;  %1592 = vst [vmem:[%s2908_s23 + $0x98] sm:$0xff] %v1560_v19  ;;  %v1562_v41 = vmul.f32 %v2420_v60, %v3107_v57 }
 0x314   : > { %v2424_v58 = vpop.eup %2423  ;;  %1593 = vst [vmem:[%s2908_s23 + $0xa0] sm:$0xff] %v1561_v33  ;;  %v1563_v29 = vmul.f32 %v2422_v22, %v3089_v45 }
 0x315   : > { %v2426_v4 = vpop.eup %2425  ;;  %1594 = vst [vmem:[%s2908_s23 + $0xa8] sm:$0xff] %v1562_v41  ;;  %v1564_v37 = vmul.f32 %v2424_v58, %v3101_v53 }
 0x316   : > { %v2428_v31 = vpop.eup %2427  ;;  %1595 = vst [vmem:[%s2908_s23 + $0xb0] sm:$0xff] %v1563_v29  ;;  %v1565_v49 = vmul.f32 %v2426_v4, %v3119_v1 }
 0x317   : > { %v2430_v11 = vpop.eup %2429  ;;  %1596 = vst [vmem:[%s2908_s23 + $0xb8] sm:$0xff] %v1564_v37  ;;  %v1566_v57 = vmul.f32 %v2428_v31, %v3131_v9 }
 0x318   : > { %v2432_v34 = vpop.eup %2431  ;;  %1597 = vst [vmem:[%s2908_s23 + $0xc0] sm:$0xff] %v1565_v49  ;;  %v1567_v45 = vmul.f32 %v2430_v11, %v3113_v61 }
 0x319   : > { %v2434_v16 = vpop.eup %2433  ;;  %1598 = vst [vmem:[%s2908_s23 + $0xc8] sm:$0xff] %v1566_v57  ;;  %v1568_v53 = vmul.f32 %v2432_v34, %v3125_v5 }
 0x31a   : > { %v2436_v14 = vpop.eup %2435  ;;  %1599 = vst [vmem:[%s2908_s23 + $0xd0] sm:$0xff] %v1567_v45  ;;  %v1569_v1 = vmul.f32 %v2434_v16, %v3143_v17 }
 0x31b   : > { %v2438_v35 = vpop.eup %2437  ;;  %1600 = vst [vmem:[%s2908_s23 + $0xd8] sm:$0xff] %v1568_v53  ;;  %v1570_v38 = vmul.f32 %v2436_v14, %v3155_v26 }
 0x31c   : > { %v2440_v9 = vpop.eup %2439  ;;  %1601 = vst [vmem:[%s2908_s23 + $0xe0] sm:$0xff] %v1569_v1  ;;  %v1571_v24 = vmul.f32 %v2438_v35, %v3137_v13 }
 0x31d   : > { %1602 = vst [vmem:[%s2908_s23 + $0xe8] sm:$0xff] %v1570_v38  ;;  %v1572_v61 = vmul.f32 %v2440_v9, %v3149_v21 }
 0x31e   : > { %1603 = vst [vmem:[%s2908_s23 + $0xf0] sm:$0xff] %v1571_v24 }
 0x31f   : > { %1604 = vst [vmem:[%s2908_s23 + $0xf8] sm:$0xff] %v1572_v61 }
 0x320 PF: > { %s1837_s17 = sshll.u32 %s2655_s13, 12  ;;  %s1621_s29 = sshll.u32 %s2908_s23, 4  ;;  %s3670_s29 = int_to_ptr.vmem [resolvable:$true] %s1621_s29 }
 0x321   : > { %s3667_s26 = scalar_lea.hbm %s3732_s6, %s1837_s17  ;;  %s3674_s30 = scalar_lea.sflag [#allocation8], %s255_s21 }
 0x322   : > { %s2553_s10 = scalar_lea.vmem %s3670_s29, 4096  ;;  %p3762_p12 = scmp.ne.s32.totalorder %s3748_s20, 0 }
 0x323   : > { %p2554_p6 = scmp.ne.s32.totalorder %s3670_s29, %s2553_s10  ;;  %s2678_s13 = smov [#allocation12]  }
 0x324   : > { %s2557_s16 = sshll.u32 %s2678_s13, 4  ;;  %s2558_s16 = int_to_ptr.vmem [resolvable:$false] %s2557_s16 }
 0x325   : > { %p2555_p2 = pnand %p2554_p6, %p3762_p12  ;;  %s2559_s7 = scalar_lea.vmem %s2558_s16, 8192 }
 0x326   : > { %p2560_p13 = scmp.lt.s32.totalorder %s3670_s29, %s2558_s16  ;;  %p2561_p7 = scmp.lt.s32.totalorder %s2559_s7, %s2553_s10 }
 0x327   : > { %p2556_p0 = pneg %p2555_p2 }
 0x328   : > { %p2562_p8 = por %p2561_p7, %p2560_p13 }
 0x32a   : > { %p2563_p1 = pnand %p2562_p8, %p2556_p0 }
 0x32c   : > { %2566 = shalt.err (!%p2563_p1)
}
 0x32d   : > { %s2567_s4 = scalar_lea.hbm %s3667_s26, 4096  ;;  %s2571_s22 = scalar_lea.hbm %s3732_s6, 16384 }
 0x32e   : > { %p2568_p11 = scmp.ne.s32.totalorder %s3667_s26, %s2567_s4  ;;  %p2572_p10 = scmp.lt.s32.totalorder %s3667_s26, %s3732_s6 }
 0x32f   : > { %p2573_p9 = scmp.lt.s32.totalorder %s2571_s22, %s2567_s4 }
 0x330   : > { %p2569_p3 = pnand %p2568_p11, %p3762_p12 }
 0x331   : > { %p2574_p4 = por %p2573_p9, %p2572_p10 }
 0x332   : > { %p2570_p5 = pneg %p2569_p3 }
 0x334   : > { %p2575_p6 = pnand %p2574_p4, %p2570_p5 }
 0x336   : > { %2578 = shalt.err (!%p2575_p6)
}
 0x337   : > { %s2679_s18 = smov 128   ;;  %s2680_s19 = smov 8  }
 0x338   : > { %1938 = dma.vmem_to_hbm [thread:$0]  (%p3762_p12), %s3670_s29, 4096, %s3667_s26, %s3674_s30, %s2679_s18, %s2679_s18, %s2680_s19  }
 0x339 PF: > { %s3763_s25 = sld [smem:[#allocation20_spill]]  ;;  %p1962_p2 = scmp.ge.s32.totalorder %s2663_s15, 2 }
 0x33a   : > { %s1636_s24 = sand.u32 1, %s2631_s2  }
 0x33b   : > { %s1637_s1 = scalar_lea.sflag [#allocation8], %s1636_s24 }
 0x33f   : > { %p3764_p0 = scmp.ne.s32.totalorder %s3763_s25, 0 }
 0x341   : > { %p1954_p13 = pnand %p1962_p2, %p3764_p0 }
 0x343   : > { %p1955_p7 = pneg %p1954_p13 }
 0x345   : > { %2626 = dma.done.wait (%p1955_p7), %s1637_s1, 4096  }
 0x346   : > { %2628 = vsyncadd (%p1955_p7), %s1637_s1, 4294963200  ;;  %s35_s15 = sadd.s32 1, %s2663_s15   ;;  %s3765_s17 = sld [smem:[#allocation19_spill]] }
 0x347   : > { %p32_p8 = scmp.ge.s32.totalorder %s35_s15, 6   ;;  %s3766_s9 = sld [smem:[#allocation22_spill]] }
 0x348   : > { %s3767_s20 = sld [smem:[#allocation21_spill]]  ;;  %s3768_s2 = smov %s2635_s8 }
 0x349   : > { %s3770_s10 = smov %s2647_s11  ;;  %s3771_s11 = smov %s2651_s12 }
 0x34a   : > { %s3772_s12 = smov %s2858_s28  ;;  %s3773_s13 = smov %s2659_s14 }
 0x34b   :  { %34 = sbr.rel (!%p32_p8) target bundleno = 36 (0x24), region = 119 }
 0x34c   : > { %s3769_s8 = smov %s3765_s17 }
 0x34e   : > { %s3774_s14 = smov %s3767_s20 }
 0x350   :  { %1642 = vsyncpa [#allocation7], 1 }
 0x351   :  { %1644 = vsyncpa [#allocation7 + $0x1], 1 }
 0x352   :  { %1645 = vsyncpa [#allocation10], 1 }
 0x353   :  { %1646 = vsyncpa [#allocation8], 1 }
 0x354   :  { %1648 = vsyncpa [#allocation8 + $0x1], 1 }

</bundles_post_ra>
